<compile_context>
chip_gen: v7x
topology: tpu7x:2x2x1
jax: 0.10.0
libtpu: 0.0.40
codegen_flags: <defaults>
</compile_context>

<pallas_src>
import math
import functools

import jax
import jax.numpy as jnp
from jax.experimental import pallas as pl
from jax.experimental.pallas import tpu as pltpu


def _round_up(x, m):
    return (x + m - 1) // m * m


def _conv_t_kernel(x_ref, w_ref, b_ref, o_ref, *, K, Wp, TM):
    """One (image, column-block) grid step.

    x_ref : (1, 1, Cin, TM + halo)  pre-gathered input window (bf16)
    w_ref : (K*K, Cout, Cin)        flipped / scaled per-tap weights (bf16)
    b_ref : (Cout, 1)               bias (f32)
    o_ref : (1, Cout, TM)           pitch-Wp output slab (lane dense)
    """
    acc = None
    for ky in range(K):
        for kx in range(K):
            t = ky * K + kx
            off = ky * Wp + kx                          # static python int
            rhs = x_ref[0, 0, :, off:off + TM]          # (Cin, TM), static slice
            part = jnp.dot(w_ref[t], rhs, preferred_element_type=jnp.float32)
            acc = part if acc is None else acc + part
    acc = acc + b_ref[...]                              # f32 bias broadcast
    o_ref[0] = acc.astype(o_ref.dtype)                  # single dense slab store


def equal_conv_transpose2d(x_nchw, weight, bias, *, stride=1, padding=0,
                           col_block=None, compute_dtype=jnp.bfloat16,
                           out_dtype=jnp.float32):
    """x_nchw: (N, Cin, H, W); weight: (Cin, Cout, K, K); bias: (Cout,) or None."""
    N, Cin, H, W = x_nchw.shape
    Cin_w, Cout, K, K2 = weight.shape
    assert Cin == Cin_w and K == K2
    assert stride >= 1
    assert 0 <= padding <= K - 1, "requires 0 <= padding <= kernel_size - 1"

    scale = 1.0 / math.sqrt(Cin * K * K)
    e = K - 1 - padding
    OH = (H - 1) * stride - 2 * padding + K
    OW = (W - 1) * stride - 2 * padding + K

    # Transposed conv == stride-1 conv over the zero-dilated + edge-padded
    # input with the spatially flipped, (Cin,Cout)-swapped weight.
    x_c = x_nchw.astype(compute_dtype)
    x_dil = jax.lax.pad(
        x_c, jnp.asarray(0, dtype=compute_dtype),
        [(0, 0, 0), (0, 0, 0),
         (e, e, stride - 1), (e, e, stride - 1)])        # (N, Cin, Hp, Wp)
    Hp, Wp = x_dil.shape[2], x_dil.shape[3]
    assert OH == Hp - K + 1 and OW == Wp - K + 1

    # ---- column blocking over the pitch-Wp flat output ---------------------
    m_valid = OH * Wp                                    # columns holding real rows
    if col_block is None:
        # Cap the f32 accumulator (Cout, TM) at ~128 KiB (~32 vregs).
        # (When hand-tiling for v6e/v7x, prefer multiples of 256.)
        cap = max(128, ((128 << 10) // (Cout * 4)) // 128 * 128)
        TM = min(cap, _round_up(m_valid, 128))
    else:
        assert col_block > 0 and col_block % 128 == 0
        TM = col_block
    n_blocks = (m_valid + TM - 1) // TM
    M_pad = n_blocks * TM
    halo = (K - 1) * Wp + (K - 1)
    TMH = TM + halo

    # Flatten and zero-pad so every (block, tap) window is in range, then
    # pre-gather overlapping per-block windows (all kernel slices static,
    # per-step VMEM bounded; duplication overhead = halo / TM).
    L_need = (n_blocks - 1) * TM + TMH                   # == M_pad + halo
    x_flat = x_dil.reshape(N, Cin, Hp * Wp)
    x_flat = jnp.pad(x_flat, ((0, 0), (0, 0), (0, L_need - Hp * Wp)))
    x_blk = jnp.stack(
        [x_flat[:, :, i * TM:i * TM + TMH] for i in range(n_blocks)],
        axis=1)                                          # (N, n_blocks, Cin, TMH)

    # Per-tap weights: w_taps[ky*K+kx, co, ci] = scale * W[ci, co, K-1-ky, K-1-kx]
    w_flip = (weight * scale)[:, :, ::-1, ::-1]          # (Cin, Cout, K, K)
    w_taps = jnp.transpose(w_flip, (2, 3, 1, 0)).reshape(K * K, Cout, Cin)
    w_taps = w_taps.astype(compute_dtype)

    if bias is None:
        bias = jnp.zeros((Cout,), jnp.float32)
    b2 = bias.reshape(Cout, 1).astype(jnp.float32)

    kernel = functools.partial(_conv_t_kernel, K=K, Wp=Wp, TM=TM)

    in_isz = jnp.dtype(compute_dtype).itemsize
    out_isz = jnp.dtype(out_dtype).itemsize
    vmem_need = (2 * Cin * TMH * in_isz            # double-buffered input window
                 + 2 * Cout * TM * out_isz         # double-buffered output slab
                 + K * K * Cout * Cin * in_isz + Cout * 4
                 + (2 << 20))                      # headroom for internal scratch
    vmem_limit = int(min(max(vmem_need, 16 << 20), 32 << 20))

    out_flat = pl.pallas_call(
        kernel,
        out_shape=jax.ShapeDtypeStruct((N, Cout, M_pad), out_dtype),
        grid=(N, n_blocks),
        in_specs=[
            pl.BlockSpec((1, 1, Cin, TMH), lambda n, m: (n, m, 0, 0)),
            pl.BlockSpec((K * K, Cout, Cin), lambda n, m: (0, 0, 0)),
            pl.BlockSpec((Cout, 1), lambda n, m: (0, 0)),
        ],
        # pitch-Wp, TM(=multiple of 128)-wide output slab -> dense stores.
        out_specs=pl.BlockSpec((1, Cout, TM), lambda n, m: (n, 0, m)),
        compiler_params=pltpu.CompilerParams(
            # batch shards across the 2 TCs on v7x; column blocks pipeline.
            dimension_semantics=("parallel", "arbitrary"),
            vmem_limit_bytes=vmem_limit,
        ),
    )(x_blk, w_taps, b2)

    # Strip the pitch-Wp wrap columns / padded rows (cheap wrapper slice).
    out = out_flat[:, :, :OH * Wp].reshape(N, Cout, OH, Wp)[:, :, :, :OW]
    return out


def _reference(x_nchw, weight, bias, *, stride, padding, compute_dtype=jnp.bfloat16):
    """Pure-JAX reference for F.conv_transpose2d with operands quantized to the
    kernel's compute dtype (like-for-like comparison)."""
    Cin, Cout, K, _ = weight.shape
    scale = 1.0 / math.sqrt(Cin * K * K)
    wq = (weight * scale).astype(compute_dtype).astype(jnp.float32)
    xq = x_nchw.astype(compute_dtype).astype(jnp.float32)
    w = jnp.transpose(wq[:, :, ::-1, ::-1], (1, 0, 2, 3))    # (Cout, Cin, K, K)
    out = jax.lax.conv_general_dilated(
        xq, w,
        window_strides=(1, 1),
        padding=[(K - 1 - padding, K - 1 - padding)] * 2,
        lhs_dilation=(stride, stride),
        dimension_numbers=("NCHW", "OIHW", "NCHW"),
    )
    if bias is not None:
        out = out + bias.reshape(1, Cout, 1, 1).astype(jnp.float32)
    return out


if __name__ == "__main__":
    key = jax.random.PRNGKey(0)
    k_x, k_w, k_b = jax.random.split(key, 3)

    # Module config: EqualConvTranspose2d(4, 8, kernel_size=4, stride=2, padding=1)
    N, Cin, H, W = 2, 4, 16, 16
    Cout, K, stride, padding = 8, 4, 2, 1

    x = jax.random.normal(k_x, (N, Cin, H, W), dtype=jnp.float32)
    weight = jax.random.normal(k_w, (Cin, Cout, K, K), dtype=jnp.float32)  # ~ torch.randn
    bias = 0.1 * jax.random.normal(k_b, (Cout,), dtype=jnp.float32)

    OH = (H - 1) * stride - 2 * padding + K
    OW = (W - 1) * stride - 2 * padding + K
    ref = _reference(x, weight, bias, stride=stride, padding=padding)

    # Default tiling: one dense pitch-Wp slab per image.
    out = equal_conv_transpose2d(x, weight, bias, stride=stride, padding=padding)
    out = jax.block_until_ready(out)
    assert out.shape == (N, Cout, OH, OW), out.shape
    err = float(jnp.max(jnp.abs(out - ref)))
    assert jnp.allclose(out, ref, atol=2e-2, rtol=2e-2), err

    # Explicit multi-block tiling: exercises the (batch, column-block) grid path.
    out2 = equal_conv_transpose2d(x, weight, bias, stride=stride,
                                  padding=padding, col_block=512)
    out2 = jax.block_until_ready(out2)
    err2 = float(jnp.max(jnp.abs(out2 - ref)))
    assert jnp.allclose(out2, ref, atol=2e-2, rtol=2e-2), err2

    print("KERNEL_OK")
</pallas_src>

<mosaic_0001>
module attributes {stable_mosaic.version = 11 : i64} {
  func.func @_conv_t_kernel(%arg0: i32, %arg1: i32, %arg2: memref<1x1x4x1260xbf16, #tpu.memory_space<vmem>>, %arg3: memref<16x8x4xbf16, #tpu.memory_space<vmem>>, %arg4: memref<8x1xf32, #tpu.memory_space<vmem>>, %arg5: memref<1x8x1152xf32, #tpu.memory_space<vmem>>) attributes {dimension_semantics = [#tpu.dimension_semantics<parallel>, #tpu.dimension_semantics<arbitrary>], iteration_bounds = array<i64: 2, 1>, scalar_prefetch = 0 : i64, scratch_operands = 0 : i64, tpu.core_type = #tpu.core_type<tc>, window_params = [{transform_indices = @transform_0, window_bounds = array<i64: 1, 1, 4, 1260>}, {pipeline_mode = #tpu.pipeline_mode<synchronous>, transform_indices = @transform_1, window_bounds = array<i64: 16, 8, 4>}, {pipeline_mode = #tpu.pipeline_mode<synchronous>, transform_indices = @transform_2, window_bounds = array<i64: 8, 1>}, {transform_indices = @transform_3, window_bounds = array<i64: 1, 8, 1152>}]} {
    %c0 = arith.constant 0 : index
    %c0_0 = arith.constant 0 : index
    %c0_1 = arith.constant 0 : index
    %c0_2 = arith.constant 0 : index
    %0 = vector.load %arg2[%c0, %c0_0, %c0_1, %c0_2] : memref<1x1x4x1260xbf16, #tpu.memory_space<vmem>>, vector<1x1x4x1152xbf16>
    %1 = vector.shape_cast %0 : vector<1x1x4x1152xbf16> to vector<4x1152xbf16>
    %c0_3 = arith.constant 0 : index
    %c0_4 = arith.constant 0 : index
    %c0_5 = arith.constant 0 : index
    %2 = vector.load %arg3[%c0_3, %c0_4, %c0_5] : memref<16x8x4xbf16, #tpu.memory_space<vmem>>, vector<1x8x4xbf16>
    %3 = vector.shape_cast %2 : vector<1x8x4xbf16> to vector<8x4xbf16>
    %cst = arith.constant dense<0.000000e+00> : vector<8x1152xf32>
    %4 = tpu.matmul %3, %1, %cst {dimension_numbers = #tpu.dot_dimension_numbers<[1], [0], [0], [1], [0, 0, 1, 1], [], []>} : vector<8x4xbf16>, vector<4x1152xbf16>, vector<8x1152xf32> -> vector<8x1152xf32>
    %c0_6 = arith.constant 0 : index
    %c0_7 = arith.constant 0 : index
    %c0_8 = arith.constant 0 : index
    %c1 = arith.constant 1 : index
    %5 = vector.load %arg2[%c0_6, %c0_7, %c0_8, %c1] : memref<1x1x4x1260xbf16, #tpu.memory_space<vmem>>, vector<1x1x4x1152xbf16>
    %6 = vector.shape_cast %5 : vector<1x1x4x1152xbf16> to vector<4x1152xbf16>
    %c1_9 = arith.constant 1 : index
    %c0_10 = arith.constant 0 : index
    %c0_11 = arith.constant 0 : index
    %7 = vector.load %arg3[%c1_9, %c0_10, %c0_11] : memref<16x8x4xbf16, #tpu.memory_space<vmem>>, vector<1x8x4xbf16>
    %8 = vector.shape_cast %7 : vector<1x8x4xbf16> to vector<8x4xbf16>
    %cst_12 = arith.constant dense<0.000000e+00> : vector<8x1152xf32>
    %9 = tpu.matmul %8, %6, %cst_12 {dimension_numbers = #tpu.dot_dimension_numbers<[1], [0], [0], [1], [0, 0, 1, 1], [], []>} : vector<8x4xbf16>, vector<4x1152xbf16>, vector<8x1152xf32> -> vector<8x1152xf32>
    %10 = arith.addf %4, %9 : vector<8x1152xf32>
    %c0_13 = arith.constant 0 : index
    %c0_14 = arith.constant 0 : index
    %c0_15 = arith.constant 0 : index
    %c2 = arith.constant 2 : index
    %11 = vector.load %arg2[%c0_13, %c0_14, %c0_15, %c2] : memref<1x1x4x1260xbf16, #tpu.memory_space<vmem>>, vector<1x1x4x1152xbf16>
    %12 = vector.shape_cast %11 : vector<1x1x4x1152xbf16> to vector<4x1152xbf16>
    %c2_16 = arith.constant 2 : index
    %c0_17 = arith.constant 0 : index
    %c0_18 = arith.constant 0 : index
    %13 = vector.load %arg3[%c2_16, %c0_17, %c0_18] : memref<16x8x4xbf16, #tpu.memory_space<vmem>>, vector<1x8x4xbf16>
    %14 = vector.shape_cast %13 : vector<1x8x4xbf16> to vector<8x4xbf16>
    %cst_19 = arith.constant dense<0.000000e+00> : vector<8x1152xf32>
    %15 = tpu.matmul %14, %12, %cst_19 {dimension_numbers = #tpu.dot_dimension_numbers<[1], [0], [0], [1], [0, 0, 1, 1], [], []>} : vector<8x4xbf16>, vector<4x1152xbf16>, vector<8x1152xf32> -> vector<8x1152xf32>
    %16 = arith.addf %10, %15 : vector<8x1152xf32>
    %c0_20 = arith.constant 0 : index
    %c0_21 = arith.constant 0 : index
    %c0_22 = arith.constant 0 : index
    %c3 = arith.constant 3 : index
    %17 = vector.load %arg2[%c0_20, %c0_21, %c0_22, %c3] : memref<1x1x4x1260xbf16, #tpu.memory_space<vmem>>, vector<1x1x4x1152xbf16>
    %18 = vector.shape_cast %17 : vector<1x1x4x1152xbf16> to vector<4x1152xbf16>
    %c3_23 = arith.constant 3 : index
    %c0_24 = arith.constant 0 : index
    %c0_25 = arith.constant 0 : index
    %19 = vector.load %arg3[%c3_23, %c0_24, %c0_25] : memref<16x8x4xbf16, #tpu.memory_space<vmem>>, vector<1x8x4xbf16>
    %20 = vector.shape_cast %19 : vector<1x8x4xbf16> to vector<8x4xbf16>
    %cst_26 = arith.constant dense<0.000000e+00> : vector<8x1152xf32>
    %21 = tpu.matmul %20, %18, %cst_26 {dimension_numbers = #tpu.dot_dimension_numbers<[1], [0], [0], [1], [0, 0, 1, 1], [], []>} : vector<8x4xbf16>, vector<4x1152xbf16>, vector<8x1152xf32> -> vector<8x1152xf32>
    %22 = arith.addf %16, %21 : vector<8x1152xf32>
    %c0_27 = arith.constant 0 : index
    %c0_28 = arith.constant 0 : index
    %c0_29 = arith.constant 0 : index
    %c35 = arith.constant 35 : index
    %23 = vector.load %arg2[%c0_27, %c0_28, %c0_29, %c35] : memref<1x1x4x1260xbf16, #tpu.memory_space<vmem>>, vector<1x1x4x1152xbf16>
    %24 = vector.shape_cast %23 : vector<1x1x4x1152xbf16> to vector<4x1152xbf16>
    %c4 = arith.constant 4 : index
    %c0_30 = arith.constant 0 : index
    %c0_31 = arith.constant 0 : index
    %25 = vector.load %arg3[%c4, %c0_30, %c0_31] : memref<16x8x4xbf16, #tpu.memory_space<vmem>>, vector<1x8x4xbf16>
    %26 = vector.shape_cast %25 : vector<1x8x4xbf16> to vector<8x4xbf16>
    %cst_32 = arith.constant dense<0.000000e+00> : vector<8x1152xf32>
    %27 = tpu.matmul %26, %24, %cst_32 {dimension_numbers = #tpu.dot_dimension_numbers<[1], [0], [0], [1], [0, 0, 1, 1], [], []>} : vector<8x4xbf16>, vector<4x1152xbf16>, vector<8x1152xf32> -> vector<8x1152xf32>
    %28 = arith.addf %22, %27 : vector<8x1152xf32>
    %c0_33 = arith.constant 0 : index
    %c0_34 = arith.constant 0 : index
    %c0_35 = arith.constant 0 : index
    %c36 = arith.constant 36 : index
    %29 = vector.load %arg2[%c0_33, %c0_34, %c0_35, %c36] : memref<1x1x4x1260xbf16, #tpu.memory_space<vmem>>, vector<1x1x4x1152xbf16>
    %30 = vector.shape_cast %29 : vector<1x1x4x1152xbf16> to vector<4x1152xbf16>
    %c5 = arith.constant 5 : index
    %c0_36 = arith.constant 0 : index
    %c0_37 = arith.constant 0 : index
    %31 = vector.load %arg3[%c5, %c0_36, %c0_37] : memref<16x8x4xbf16, #tpu.memory_space<vmem>>, vector<1x8x4xbf16>
    %32 = vector.shape_cast %31 : vector<1x8x4xbf16> to vector<8x4xbf16>
    %cst_38 = arith.constant dense<0.000000e+00> : vector<8x1152xf32>
    %33 = tpu.matmul %32, %30, %cst_38 {dimension_numbers = #tpu.dot_dimension_numbers<[1], [0], [0], [1], [0, 0, 1, 1], [], []>} : vector<8x4xbf16>, vector<4x1152xbf16>, vector<8x1152xf32> -> vector<8x1152xf32>
    %34 = arith.addf %28, %33 : vector<8x1152xf32>
    %c0_39 = arith.constant 0 : index
    %c0_40 = arith.constant 0 : index
    %c0_41 = arith.constant 0 : index
    %c37 = arith.constant 37 : index
    %35 = vector.load %arg2[%c0_39, %c0_40, %c0_41, %c37] : memref<1x1x4x1260xbf16, #tpu.memory_space<vmem>>, vector<1x1x4x1152xbf16>
    %36 = vector.shape_cast %35 : vector<1x1x4x1152xbf16> to vector<4x1152xbf16>
    %c6 = arith.constant 6 : index
    %c0_42 = arith.constant 0 : index
    %c0_43 = arith.constant 0 : index
    %37 = vector.load %arg3[%c6, %c0_42, %c0_43] : memref<16x8x4xbf16, #tpu.memory_space<vmem>>, vector<1x8x4xbf16>
    %38 = vector.shape_cast %37 : vector<1x8x4xbf16> to vector<8x4xbf16>
    %cst_44 = arith.constant dense<0.000000e+00> : vector<8x1152xf32>
    %39 = tpu.matmul %38, %36, %cst_44 {dimension_numbers = #tpu.dot_dimension_numbers<[1], [0], [0], [1], [0, 0, 1, 1], [], []>} : vector<8x4xbf16>, vector<4x1152xbf16>, vector<8x1152xf32> -> vector<8x1152xf32>
    %40 = arith.addf %34, %39 : vector<8x1152xf32>
    %c0_45 = arith.constant 0 : index
    %c0_46 = arith.constant 0 : index
    %c0_47 = arith.constant 0 : index
    %c38 = arith.constant 38 : index
    %41 = vector.load %arg2[%c0_45, %c0_46, %c0_47, %c38] : memref<1x1x4x1260xbf16, #tpu.memory_space<vmem>>, vector<1x1x4x1152xbf16>
    %42 = vector.shape_cast %41 : vector<1x1x4x1152xbf16> to vector<4x1152xbf16>
    %c7 = arith.constant 7 : index
    %c0_48 = arith.constant 0 : index
    %c0_49 = arith.constant 0 : index
    %43 = vector.load %arg3[%c7, %c0_48, %c0_49] : memref<16x8x4xbf16, #tpu.memory_space<vmem>>, vector<1x8x4xbf16>
    %44 = vector.shape_cast %43 : vector<1x8x4xbf16> to vector<8x4xbf16>
    %cst_50 = arith.constant dense<0.000000e+00> : vector<8x1152xf32>
    %45 = tpu.matmul %44, %42, %cst_50 {dimension_numbers = #tpu.dot_dimension_numbers<[1], [0], [0], [1], [0, 0, 1, 1], [], []>} : vector<8x4xbf16>, vector<4x1152xbf16>, vector<8x1152xf32> -> vector<8x1152xf32>
    %46 = arith.addf %40, %45 : vector<8x1152xf32>
    %c0_51 = arith.constant 0 : index
    %c0_52 = arith.constant 0 : index
    %c0_53 = arith.constant 0 : index
    %c70 = arith.constant 70 : index
    %47 = vector.load %arg2[%c0_51, %c0_52, %c0_53, %c70] : memref<1x1x4x1260xbf16, #tpu.memory_space<vmem>>, vector<1x1x4x1152xbf16>
    %48 = vector.shape_cast %47 : vector<1x1x4x1152xbf16> to vector<4x1152xbf16>
    %c8 = arith.constant 8 : index
    %c0_54 = arith.constant 0 : index
    %c0_55 = arith.constant 0 : index
    %49 = vector.load %arg3[%c8, %c0_54, %c0_55] : memref<16x8x4xbf16, #tpu.memory_space<vmem>>, vector<1x8x4xbf16>
    %50 = vector.shape_cast %49 : vector<1x8x4xbf16> to vector<8x4xbf16>
    %cst_56 = arith.constant dense<0.000000e+00> : vector<8x1152xf32>
    %51 = tpu.matmul %50, %48, %cst_56 {dimension_numbers = #tpu.dot_dimension_numbers<[1], [0], [0], [1], [0, 0, 1, 1], [], []>} : vector<8x4xbf16>, vector<4x1152xbf16>, vector<8x1152xf32> -> vector<8x1152xf32>
    %52 = arith.addf %46, %51 : vector<8x1152xf32>
    %c0_57 = arith.constant 0 : index
    %c0_58 = arith.constant 0 : index
    %c0_59 = arith.constant 0 : index
    %c71 = arith.constant 71 : index
    %53 = vector.load %arg2[%c0_57, %c0_58, %c0_59, %c71] : memref<1x1x4x1260xbf16, #tpu.memory_space<vmem>>, vector<1x1x4x1152xbf16>
    %54 = vector.shape_cast %53 : vector<1x1x4x1152xbf16> to vector<4x1152xbf16>
    %c9 = arith.constant 9 : index
    %c0_60 = arith.constant 0 : index
    %c0_61 = arith.constant 0 : index
    %55 = vector.load %arg3[%c9, %c0_60, %c0_61] : memref<16x8x4xbf16, #tpu.memory_space<vmem>>, vector<1x8x4xbf16>
    %56 = vector.shape_cast %55 : vector<1x8x4xbf16> to vector<8x4xbf16>
    %cst_62 = arith.constant dense<0.000000e+00> : vector<8x1152xf32>
    %57 = tpu.matmul %56, %54, %cst_62 {dimension_numbers = #tpu.dot_dimension_numbers<[1], [0], [0], [1], [0, 0, 1, 1], [], []>} : vector<8x4xbf16>, vector<4x1152xbf16>, vector<8x1152xf32> -> vector<8x1152xf32>
    %58 = arith.addf %52, %57 : vector<8x1152xf32>
    %c0_63 = arith.constant 0 : index
    %c0_64 = arith.constant 0 : index
    %c0_65 = arith.constant 0 : index
    %c72 = arith.constant 72 : index
    %59 = vector.load %arg2[%c0_63, %c0_64, %c0_65, %c72] : memref<1x1x4x1260xbf16, #tpu.memory_space<vmem>>, vector<1x1x4x1152xbf16>
    %60 = vector.shape_cast %59 : vector<1x1x4x1152xbf16> to vector<4x1152xbf16>
    %c10 = arith.constant 10 : index
    %c0_66 = arith.constant 0 : index
    %c0_67 = arith.constant 0 : index
    %61 = vector.load %arg3[%c10, %c0_66, %c0_67] : memref<16x8x4xbf16, #tpu.memory_space<vmem>>, vector<1x8x4xbf16>
    %62 = vector.shape_cast %61 : vector<1x8x4xbf16> to vector<8x4xbf16>
    %cst_68 = arith.constant dense<0.000000e+00> : vector<8x1152xf32>
    %63 = tpu.matmul %62, %60, %cst_68 {dimension_numbers = #tpu.dot_dimension_numbers<[1], [0], [0], [1], [0, 0, 1, 1], [], []>} : vector<8x4xbf16>, vector<4x1152xbf16>, vector<8x1152xf32> -> vector<8x1152xf32>
    %64 = arith.addf %58, %63 : vector<8x1152xf32>
    %c0_69 = arith.constant 0 : index
    %c0_70 = arith.constant 0 : index
    %c0_71 = arith.constant 0 : index
    %c73 = arith.constant 73 : index
    %65 = vector.load %arg2[%c0_69, %c0_70, %c0_71, %c73] : memref<1x1x4x1260xbf16, #tpu.memory_space<vmem>>, vector<1x1x4x1152xbf16>
    %66 = vector.shape_cast %65 : vector<1x1x4x1152xbf16> to vector<4x1152xbf16>
    %c11 = arith.constant 11 : index
    %c0_72 = arith.constant 0 : index
    %c0_73 = arith.constant 0 : index
    %67 = vector.load %arg3[%c11, %c0_72, %c0_73] : memref<16x8x4xbf16, #tpu.memory_space<vmem>>, vector<1x8x4xbf16>
    %68 = vector.shape_cast %67 : vector<1x8x4xbf16> to vector<8x4xbf16>
    %cst_74 = arith.constant dense<0.000000e+00> : vector<8x1152xf32>
    %69 = tpu.matmul %68, %66, %cst_74 {dimension_numbers = #tpu.dot_dimension_numbers<[1], [0], [0], [1], [0, 0, 1, 1], [], []>} : vector<8x4xbf16>, vector<4x1152xbf16>, vector<8x1152xf32> -> vector<8x1152xf32>
    %70 = arith.addf %64, %69 : vector<8x1152xf32>
    %c0_75 = arith.constant 0 : index
    %c0_76 = arith.constant 0 : index
    %c0_77 = arith.constant 0 : index
    %c105 = arith.constant 105 : index
    %71 = vector.load %arg2[%c0_75, %c0_76, %c0_77, %c105] : memref<1x1x4x1260xbf16, #tpu.memory_space<vmem>>, vector<1x1x4x1152xbf16>
    %72 = vector.shape_cast %71 : vector<1x1x4x1152xbf16> to vector<4x1152xbf16>
    %c12 = arith.constant 12 : index
    %c0_78 = arith.constant 0 : index
    %c0_79 = arith.constant 0 : index
    %73 = vector.load %arg3[%c12, %c0_78, %c0_79] : memref<16x8x4xbf16, #tpu.memory_space<vmem>>, vector<1x8x4xbf16>
    %74 = vector.shape_cast %73 : vector<1x8x4xbf16> to vector<8x4xbf16>
    %cst_80 = arith.constant dense<0.000000e+00> : vector<8x1152xf32>
    %75 = tpu.matmul %74, %72, %cst_80 {dimension_numbers = #tpu.dot_dimension_numbers<[1], [0], [0], [1], [0, 0, 1, 1], [], []>} : vector<8x4xbf16>, vector<4x1152xbf16>, vector<8x1152xf32> -> vector<8x1152xf32>
    %76 = arith.addf %70, %75 : vector<8x1152xf32>
    %c0_81 = arith.constant 0 : index
    %c0_82 = arith.constant 0 : index
    %c0_83 = arith.constant 0 : index
    %c106 = arith.constant 106 : index
    %77 = vector.load %arg2[%c0_81, %c0_82, %c0_83, %c106] : memref<1x1x4x1260xbf16, #tpu.memory_space<vmem>>, vector<1x1x4x1152xbf16>
    %78 = vector.shape_cast %77 : vector<1x1x4x1152xbf16> to vector<4x1152xbf16>
    %c13 = arith.constant 13 : index
    %c0_84 = arith.constant 0 : index
    %c0_85 = arith.constant 0 : index
    %79 = vector.load %arg3[%c13, %c0_84, %c0_85] : memref<16x8x4xbf16, #tpu.memory_space<vmem>>, vector<1x8x4xbf16>
    %80 = vector.shape_cast %79 : vector<1x8x4xbf16> to vector<8x4xbf16>
    %cst_86 = arith.constant dense<0.000000e+00> : vector<8x1152xf32>
    %81 = tpu.matmul %80, %78, %cst_86 {dimension_numbers = #tpu.dot_dimension_numbers<[1], [0], [0], [1], [0, 0, 1, 1], [], []>} : vector<8x4xbf16>, vector<4x1152xbf16>, vector<8x1152xf32> -> vector<8x1152xf32>
    %82 = arith.addf %76, %81 : vector<8x1152xf32>
    %c0_87 = arith.constant 0 : index
    %c0_88 = arith.constant 0 : index
    %c0_89 = arith.constant 0 : index
    %c107 = arith.constant 107 : index
    %83 = vector.load %arg2[%c0_87, %c0_88, %c0_89, %c107] : memref<1x1x4x1260xbf16, #tpu.memory_space<vmem>>, vector<1x1x4x1152xbf16>
    %84 = vector.shape_cast %83 : vector<1x1x4x1152xbf16> to vector<4x1152xbf16>
    %c14 = arith.constant 14 : index
    %c0_90 = arith.constant 0 : index
    %c0_91 = arith.constant 0 : index
    %85 = vector.load %arg3[%c14, %c0_90, %c0_91] : memref<16x8x4xbf16, #tpu.memory_space<vmem>>, vector<1x8x4xbf16>
    %86 = vector.shape_cast %85 : vector<1x8x4xbf16> to vector<8x4xbf16>
    %cst_92 = arith.constant dense<0.000000e+00> : vector<8x1152xf32>
    %87 = tpu.matmul %86, %84, %cst_92 {dimension_numbers = #tpu.dot_dimension_numbers<[1], [0], [0], [1], [0, 0, 1, 1], [], []>} : vector<8x4xbf16>, vector<4x1152xbf16>, vector<8x1152xf32> -> vector<8x1152xf32>
    %88 = arith.addf %82, %87 : vector<8x1152xf32>
    %c0_93 = arith.constant 0 : index
    %c0_94 = arith.constant 0 : index
    %c0_95 = arith.constant 0 : index
    %c108 = arith.constant 108 : index
    %89 = vector.load %arg2[%c0_93, %c0_94, %c0_95, %c108] : memref<1x1x4x1260xbf16, #tpu.memory_space<vmem>>, vector<1x1x4x1152xbf16>
    %90 = vector.shape_cast %89 : vector<1x1x4x1152xbf16> to vector<4x1152xbf16>
    %c15 = arith.constant 15 : index
    %c0_96 = arith.constant 0 : index
    %c0_97 = arith.constant 0 : index
    %91 = vector.load %arg3[%c15, %c0_96, %c0_97] : memref<16x8x4xbf16, #tpu.memory_space<vmem>>, vector<1x8x4xbf16>
    %92 = vector.shape_cast %91 : vector<1x8x4xbf16> to vector<8x4xbf16>
    %cst_98 = arith.constant dense<0.000000e+00> : vector<8x1152xf32>
    %93 = tpu.matmul %92, %90, %cst_98 {dimension_numbers = #tpu.dot_dimension_numbers<[1], [0], [0], [1], [0, 0, 1, 1], [], []>} : vector<8x4xbf16>, vector<4x1152xbf16>, vector<8x1152xf32> -> vector<8x1152xf32>
    %94 = arith.addf %88, %93 : vector<8x1152xf32>
    %c0_99 = arith.constant 0 : index
    %c0_100 = arith.constant 0 : index
    %95 = vector.load %arg4[%c0_99, %c0_100] : memref<8x1xf32, #tpu.memory_space<vmem>>, vector<8x1xf32>
    %96 = vector.broadcast %95 : vector<8x1xf32> to vector<8x1152xf32>
    %97 = arith.addf %94, %96 : vector<8x1152xf32>
    %c0_101 = arith.constant 0 : index
    %c0_102 = arith.constant 0 : index
    %c0_103 = arith.constant 0 : index
    %98 = vector.load %arg5[%c0_101, %c0_102, %c0_103] : memref<1x8x1152xf32, #tpu.memory_space<vmem>>, vector<1x8x1152xf32>
    %99 = vector.shape_cast %98 : vector<1x8x1152xf32> to vector<8x1152xf32>
    %100 = vector.shape_cast %97 : vector<8x1152xf32> to vector<1x8x1152xf32>
    tpu.vector_store %arg5[%c0_101, %c0_102, %c0_103], %100 {strides = array<i32>} : memref<1x8x1152xf32, #tpu.memory_space<vmem>>, vector<1x8x1152xf32>,
    return
  }
  func.func @transform_0(%arg0: i32, %arg1: i32) -> (i32, i32, i32, i32) {
    %c0_i32 = arith.constant 0 : i32
    %c0_i32_0 = arith.constant 0 : i32
    %c0_i32_1 = arith.constant 0 : i32
    return %arg0, %arg1, %c0_i32, %c0_i32_0 : i32, i32, i32, i32
  }
  func.func @transform_1(%arg0: i32, %arg1: i32) -> (i32, i32, i32) {
    %c0_i32 = arith.constant 0 : i32
    %c0_i32_0 = arith.constant 0 : i32
    %c0_i32_1 = arith.constant 0 : i32
    %c0_i32_2 = arith.constant 0 : i32
    return %c0_i32, %c0_i32_0, %c0_i32_1 : i32, i32, i32
  }
  func.func @transform_2(%arg0: i32, %arg1: i32) -> (i32, i32) {
    %c0_i32 = arith.constant 0 : i32
    %c0_i32_0 = arith.constant 0 : i32
    %c0_i32_1 = arith.constant 0 : i32
    return %c0_i32, %c0_i32_0 : i32, i32
  }
  func.func @transform_3(%arg0: i32, %arg1: i32) -> (i32, i32, i32) {
    %c0_i32 = arith.constant 0 : i32
    %c0_i32_0 = arith.constant 0 : i32
    return %arg0, %c0_i32, %arg1 : i32, i32, i32
  }
}

</mosaic_0001>

<bundles_post_ra>
// kernel: tpu_custom_call.1
= control target key start
LH: loop header
LB: loop body
LE: loop exit
PB: predicated region body
PF: predicated region fallthrough
CT: control target
= control target key end

     0   :  { %8 = vsyncpa [#allocation3], 0  ;;  %s7036_s0 = inlined_call_operand.vmem [shape: bf16[2,1,4,1260], index: 0, kind: input, shape index: {}]   ;;  %s7037_s1 = inlined_call_operand.vmem [shape: bf16[16,8,4], index: 1, kind: input, shape index: {}]   ;;  %s7038_s2 = inlined_call_operand.vmem [shape: f32[8,1], index: 2, kind: input, shape index: {}]   ;;  %s7039_s3 = inlined_call_operand.hbm [shape: f32[2,8,1152], index: 3, kind: output, shape index: {}]  }
   0x1   :  { %10 = vsyncpa [#allocation3 + $0x1], 0  ;;  %s5915_s12 = smov 0   ;;  %s5917_s13 = smov 0  }
   0x2   :  { %s5919_s14 = smov 0   ;;  %s5921_s15 = smov 0  }
   0x3   :  { %s5923_s16 = smov 0   ;;  %s5925_s17 = smov 0  }
   0x4 LB: > { %s5401_s18 = sadd.s32 4294967295, %s5873_s17   ;;  %s5402_s19 = sadd.s32 4294967294, %s5873_s17   ;;  %s5873_s17 = sphi %s5925_s17, %s16_s17   ;;  %s5869_s16 = sphi %s5923_s16, %s7046_s16   ;;  %s5865_s15 = sphi %s5921_s15, %s7045_s15   ;;  %s5861_s14 = sphi %s5919_s14, %s7044_s14   ;;  %s5857_s13 = sphi %s5917_s13, %s7043_s13   ;;  %s5853_s12 = sphi %s5915_s12, %s7042_s12  }
   0x5   : > { %s28_s20 = sadd.s32 1, %s5869_s16  ;;  %s107_s21 = sadd.s32 1, %s5861_s14 }
   0x6   : > { %p30_p0 = scmp.ge.s32.totalorder %s28_s20, 2  ;;  %p117_p1 = scmp.ne.s32.totalorder %s5861_s14, %s5857_s13 }
   0x7   : > { %p118_p2 = scmp.eq.s32.totalorder %s5401_s18, 1  ;;  %p123_p3 = scmp.ne.s32.totalorder %s5857_s13, %s5853_s12 }
   0x8   : > { %s7048_s20 = smov (%p30_p0, %s28_s20), 0  ;;  %p124_p5 = scmp.eq.s32.totalorder %s5402_s19, 1 }
   0x9   : > { %p5955_p4 = por %p118_p2, %p117_p1  ;;  %s102_s23 = ssub.s32 %s5869_s16, %s7048_s20 }
   0xa   : > { %p5405_p6 = scmp.ge.s32.totalorder %s5873_s17, 1  ;;  %p105_p7 = scmp.eq.s32.totalorder %s102_s23, 0 }
   0xb   : > { %p5962_p8 = por %p124_p5, %p123_p3  ;;  %p160_p9 = scmp.lt.s32.totalorder %s5873_s17, 3 }
   0xc   : > { %s5968_s25 = scalar_select %p105_p7, %s5861_s14, %s107_s21  }
   0xd   : > { %p161_p10 = pnand %p5405_p6, %p160_p9 }
   0xe   : > { %p188_p11 = scmp.lt.s32.totalorder (!%p161_p10), %s5865_s15, 1  ;;  %v213_v0 = vlaneseq (!%p161_p10)  ;;  %v5875_v1 = vmov (!%p161_p10), 1983009808   ;;  %v5876_v6 = vmov (!%p161_p10), 0   ;;  %s5877_s4 = smov (!%p161_p10), 127   ;;  %vm271_vm0 = vcmask (!%p161_p10), 1039360  }
   0xf   : > { %164 = sbr.rel (%p161_p10) target bundleno = 700 (0x2bc), region = 32  ;;  %v211_v2 = vunpack.c.l.s4 (!%p161_p10), %v5875_v1  ;;  %345 = vmatprep.mubr.bf16.mxu0 (!%p161_p10), %v5876_v6  ;;  %386 = vmatprep.mubr.bf16.mxu1 (!%p161_p10), %v5876_v6  ;;  %s5878_s5 = smov (!%p161_p10), 126   ;;  %vm285_vm1 = vcmask (!%p161_p10), 1041408   ;;  %v5407_v28 = vld [vmem:[%s7037_s1 + $0x4] sm:$0xf] (!%p161_p10)  ;;  %vm281_vm2 = vcmask (!%p161_p10), 31744  }
  0x10   : > { %v214_v3 = vshrl.u32 (!%p161_p10), %v213_v0, 7  ;;  %5790 = vset.pattern.permute.xlu0 (!%p161_p10), %v5876_v6  ;;  %s5879_s6 = smov (!%p161_p10), 125   ;;  %s5880_s7 = smov (!%p161_p10), 93   ;;  %v5884_v41 = vmov (!%p161_p10), 0.0   ;;  %vm5885_vm3 = vmmov (!%p161_p10), 0   ;;  %vm829_vm4 = vcmask (!%p161_p10), 1031168  }
  0x11   : > { %v212_v4 = vunpack.c.0.s8 (!%p161_p10), %v211_v2  ;;  %s5881_s8 = smov (!%p161_p10), 92   ;;  %s5882_s9 = smov (!%p161_p10), 91   ;;  %v202_v53 = vld [vmem:[%s7037_s1] sm:$0xf] (!%p161_p10)  ;;  %vm1152_vm5 = vcmask (!%p161_p10), 1022976   ;;  %vm1475_vm6 = vcmask (!%p161_p10), 760832  }
  0x12   : > { %s5883_s10 = smov (!%p161_p10), 90   ;;  %s5886_s23 = smov (!%p161_p10), 58   ;;  %vm1798_vm7 = vcmask (!%p161_p10), 752640   ;;  %vm2121_vm8 = vcmask (!%p161_p10), 744448   ;;  %vm2444_vm9 = vcmask (!%p161_p10), 736256   ;;  %vm2767_vm10 = vcmask (!%p161_p10), 474112  }
  0x13   : > { %v5972_v5 = vsub.s32 (!%p161_p10), %v212_v4, %v214_v3  ;;  %s5887_s28 = smov (!%p161_p10), 57   ;;  %s5890_s11 = smov (!%p161_p10), 23   ;;  %vm3090_vm11 = vcmask (!%p161_p10), 465920   ;;  %vm3413_vm12 = vcmask (!%p161_p10), 457728   ;;  %vm3736_vm13 = vcmask (!%p161_p10), 449536  }
  0x14   : > { %s5891_s19 = smov (!%p161_p10), 22   ;;  %s5893_s29 = smov (!%p161_p10), 20   ;;  %vm4059_vm14 = vcmask (!%p161_p10), 187392   ;;  %vm4382_vm15 = vcmask (!%p161_p10), 179200  }
  0x16   : > { %s189_s26 = scalar_select %p188_p11, %s5865_s15, 1 }
  0x18   : > { %s5714_s27 = smul.u32 20, %s189_s26  ;;  %s5892_s26 = smov 21  }
  0x1a   : > { %s5979_s30 = scalar_lea.vmem %s7036_s0, %s5714_s27 }
  0x1b   : > { %v199_v7 = vld [vmem:[%s5979_s30] sm:$0xff]  ;;  %v200_v10 = vld [vmem:[%s5979_s30 + $0x8] sm:$0xff]  ;;  %v6019_v19 = vld.sshfl [vmem:[%s5979_s30 + $0x10] sm:$0x33 pattern:$0x76325410] }
  0x1c   : > { %v5984_v8 = vrot.slane %v199_v7, %v5972_v5  ;;  %v209_v9 = vcombine.high %v199_v7, %v199_v7  ;;  %v6001_v14 = vrot.slane %v200_v10, %v5972_v5  ;;  %v226_v15 = vcombine.high %v200_v10, %v200_v10  ;;  %v5418_v60 = vld.sshfl [vmem:[%s5979_s30 + $0x10] sm:$0x3 pattern:$0x76325410] }
  0x1d   : > { %v6025_v20 = vcombine.high %v6019_v19, %v6019_v19  ;;  %v553_v62 = vsel %vm285_vm1, %v5418_v60, 0 }
  0x1e   : > { %251 = vrot.lane.b32.xlu0 %v5984_v8, %s5877_s4  ;;  %v5989_v11 = vrot.slane %v209_v9, %v5972_v5  ;;  %v5993_v12 = vcombine.high %v5984_v8, %v5984_v8  ;;  %v6007_v16 = vcombine.high %v6001_v14, %v6001_v14  ;;  %v6010_v17 = vrot.slane %v226_v15, %v5972_v5 }
  0x1f   : > { %v529_v47 = vsel %vm285_vm1, %v5984_v8, 0  ;;  %v541_v54 = vsel %vm285_vm1, %v6001_v14, 0 }
  0x20   : > { %255 = vrot.lane.b32.xlu1 %v5989_v11, %s5877_s4  ;;  %v5998_v13 = vcombine.high %v5989_v11, %v5989_v11  ;;  %v6016_v18 = vcombine.high %v6010_v17, %v6010_v17  ;;  %v535_v50 = vsel %vm285_vm1, %v5989_v11, 0  ;;  %v547_v57 = vsel %vm285_vm1, %v6010_v17, 0 }
  0x22   : > { %253 = vrot.lane.b32.xlu0 %v5993_v12, %s5877_s4 }
  0x24   : > { %257 = vrot.lane.b32.xlu1 %v5998_v13, %s5877_s4 }
  0x26   : > { %259 = vrot.lane.b32.xlu0 %v6001_v14, %s5877_s4 }
  0x28   : > { %261 = vrot.lane.b32.xlu1 %v6007_v16, %s5877_s4 }
  0x2a   : > { %263 = vrot.lane.b32.xlu0 %v6010_v17, %s5877_s4 }
  0x2c   : > { %265 = vrot.lane.b32.xlu1 %v6016_v18, %s5877_s4 }
  0x2e   : > { %267 = vrot.lane.b32.xlu0 %v6019_v19, %s5877_s4 }
  0x30   : > { %269 = vrot.lane.b32.xlu1 %v6025_v20, %s5877_s4 }
  0x32   : > { %809 = vrot.lane.b32.xlu0 %v5984_v8, %s5878_s5 }
  0x34   : > { %811 = vrot.lane.b32.xlu1 %v5993_v12, %s5878_s5 }
  0x36   : > { %813 = vrot.lane.b32.xlu0 %v5989_v11, %s5878_s5 }
  0x38   : > { %815 = vrot.lane.b32.xlu1 %v5998_v13, %s5878_s5 }
  0x3a   : > { %817 = vrot.lane.b32.xlu0 %v6001_v14, %s5878_s5 }
  0x3c   : > { %819 = vrot.lane.b32.xlu1 %v6007_v16, %s5878_s5 }
  0x3e   : > { %821 = vrot.lane.b32.xlu0 %v6010_v17, %s5878_s5 }
  0x40   : > { %823 = vrot.lane.b32.xlu1 %v6016_v18, %s5878_s5 }
  0x42   : > { %825 = vrot.lane.b32.xlu0 %v6019_v19, %s5878_s5 }
  0x44   : > { %827 = vrot.lane.b32.xlu1 %v6025_v20, %s5878_s5  ;;  %s5888_s5 = smov 56  }
  0x46   : > { %1132 = vrot.lane.b32.xlu0 %v5984_v8, %s5879_s6 }
  0x48   : > { %1134 = vrot.lane.b32.xlu1 %v5993_v12, %s5879_s6 }
  0x4a   : > { %1136 = vrot.lane.b32.xlu0 %v5989_v11, %s5879_s6 }
  0x4c   : > { %1138 = vrot.lane.b32.xlu1 %v5998_v13, %s5879_s6 }
  0x4e   : > { %1140 = vrot.lane.b32.xlu0 %v6001_v14, %s5879_s6 }
  0x50   : > { %1142 = vrot.lane.b32.xlu1 %v6007_v16, %s5879_s6 }
  0x52   : > { %1144 = vrot.lane.b32.xlu0 %v6010_v17, %s5879_s6 }
  0x54   : > { %1146 = vrot.lane.b32.xlu1 %v6016_v18, %s5879_s6 }
  0x56   : > { %1148 = vrot.lane.b32.xlu0 %v6019_v19, %s5879_s6 }
  0x58   : > { %1150 = vrot.lane.b32.xlu1 %v6025_v20, %s5879_s6  ;;  %s5715_s6 = smul.u32 1152, %s5865_s15 }
  0x5a   : > { %1455 = vrot.lane.b32.xlu0 %v5984_v8, %s5880_s7 }
  0x5c   : > { %1457 = vrot.lane.b32.xlu1 %v5993_v12, %s5880_s7 }
  0x5e   : > { %1459 = vrot.lane.b32.xlu0 %v5989_v11, %s5880_s7 }
  0x60   : > { %1461 = vrot.lane.b32.xlu1 %v5998_v13, %s5880_s7 }
  0x62   : > { %1463 = vrot.lane.b32.xlu0 %v6001_v14, %s5880_s7 }
  0x64   : > { %1465 = vrot.lane.b32.xlu1 %v6007_v16, %s5880_s7 }
  0x66   : > { %1467 = vrot.lane.b32.xlu0 %v6010_v17, %s5880_s7 }
  0x68   : > { %1469 = vrot.lane.b32.xlu1 %v6016_v18, %s5880_s7 }
  0x6a   : > { %1471 = vrot.lane.b32.xlu0 %v6019_v19, %s5880_s7 }
  0x6c   : > { %1473 = vrot.lane.b32.xlu1 %v6025_v20, %s5880_s7 }
  0x6e   : > { %1778 = vrot.lane.b32.xlu0 %v5984_v8, %s5881_s8 }
  0x70   : > { %1780 = vrot.lane.b32.xlu1 %v5993_v12, %s5881_s8 }
  0x72   : > { %1782 = vrot.lane.b32.xlu0 %v5989_v11, %s5881_s8 }
  0x74   : > { %1784 = vrot.lane.b32.xlu1 %v5998_v13, %s5881_s8 }
  0x76   : > { %1786 = vrot.lane.b32.xlu0 %v6001_v14, %s5881_s8 }
  0x78   : > { %1788 = vrot.lane.b32.xlu1 %v6007_v16, %s5881_s8 }
  0x7a   : > { %1790 = vrot.lane.b32.xlu0 %v6010_v17, %s5881_s8 }
  0x7c   : > { %1792 = vrot.lane.b32.xlu1 %v6016_v18, %s5881_s8 }
  0x7e   : > { %1794 = vrot.lane.b32.xlu0 %v6019_v19, %s5881_s8 }
  0x80   : > { %1796 = vrot.lane.b32.xlu1 %v6025_v20, %s5881_s8  ;;  %s5889_s8 = smov 55  }
  0x82   : > { %2101 = vrot.lane.b32.xlu0 %v5984_v8, %s5882_s9 }
  0x84   : > { %2103 = vrot.lane.b32.xlu1 %v5993_v12, %s5882_s9 }
  0x86   : > { %2105 = vrot.lane.b32.xlu0 %v5989_v11, %s5882_s9 }
  0x88   : > { %2107 = vrot.lane.b32.xlu1 %v5998_v13, %s5882_s9 }
  0x8a   : > { %2109 = vrot.lane.b32.xlu0 %v6001_v14, %s5882_s9 }
  0x8c   : > { %2111 = vrot.lane.b32.xlu1 %v6007_v16, %s5882_s9 }
  0x8e   : > { %2113 = vrot.lane.b32.xlu0 %v6010_v17, %s5882_s9 }
  0x90   : > { %v252_v21 = vpop.permute.xlu0 %251  ;;  %2115 = vrot.lane.b32.xlu1 %v6016_v18, %s5882_s9 }
  0x92   : > { %v256_v22 = vpop.permute.xlu1 %255  ;;  %2117 = vrot.lane.b32.xlu0 %v6019_v19, %s5882_s9 }
  0x94   : > { %v254_v23 = vpop.permute.xlu0 %253  ;;  %2119 = vrot.lane.b32.xlu1 %v6025_v20, %s5882_s9 }
  0x95   : > { %v273_v24 = vsel %vm271_vm0, %v254_v23, %v256_v22  ;;  %v272_v25 = vsel %vm271_vm0, %v252_v21, %v254_v23 }
  0x96   : > { %5409 = vmatprep.subr.msk.bf16.mxu0 %vm285_vm1, %v273_v24  ;;  %v258_v26 = vpop.permute.xlu1 %257  ;;  %v287_v27 = vsel %vm285_vm1, %v272_v25, 0  ;;  %2424 = vrot.lane.b32.xlu0 %v5984_v8, %s5883_s10  ;;  %v5428_v25 = vld [vmem:[%s7037_s1 + $0x8] sm:$0xf] }
  0x97   : > { %314 = vmatpush1.bf16.msra.mxu0 %v287_v27  ;;  %v274_v29 = vsel %vm271_vm0, %v256_v22, %v258_v26 }
  0x98   : > { %v260_v30 = vpop.permute.xlu0 %259  ;;  %2426 = vrot.lane.b32.xlu1 %v5993_v12, %s5883_s10  ;;  %v293_v33 = vsel %vm285_vm1, %v274_v29, 0 }
  0x99   : > { %v275_v31 = vsel %vm271_vm0, %v258_v26, %v260_v30 }
  0x9a   : > { %5410 = vmatmul.mubr.msk.bf16.vlgmr.msra.gmra.mrb[0].mxu0 %vm281_vm2, %v5407_v28  ;;  %5411 = vmatprep.subr.msk.bf16.mxu1 %vm285_vm1, %v275_v31  ;;  %v262_v32 = vpop.permute.xlu1 %261 }
  0x9b   : > { %v276_v34 = vsel %vm271_vm0, %v260_v30, %v262_v32  ;;  %355 = vmatpush1.bf16.msra.mxu1 %v293_v33  ;;  %427 = vmatprep.mubr.bf16.mxu0 %v5876_v6 }
  0x9c   : > { %v264_v35 = vpop.permute.xlu0 %263  ;;  %2428 = vrot.lane.b32.xlu0 %v5989_v11, %s5883_s10  ;;  %2430 = vrot.lane.b32.xlu1 %v5998_v13, %s5883_s10  ;;  %v299_v38 = vsel %vm285_vm1, %v276_v34, 0 }
  0x9d   : > { %v277_v36 = vsel %vm271_vm0, %v262_v32, %v264_v35 }
  0x9e   : > { %5412 = vmatmul.mubr.msk.bf16.vlgmr.msra.gmra.mrb[0].mxu1 %vm281_vm2, %v5407_v28  ;;  %5413 = vmatprep.subr.msk.bf16.mxu0 %vm285_vm1, %v277_v36  ;;  %v266_v37 = vpop.permute.xlu1 %265 }
  0x9f   : > { %v278_v39 = vsel %vm271_vm0, %v264_v35, %v266_v37  ;;  %396 = vmatpush1.bf16.msra.mxu0 %v299_v38  ;;  %468 = vmatprep.mubr.bf16.mxu1 %v5876_v6 }
  0xa0   : > { %v268_v40 = vpop.permute.xlu0 %267  ;;  %5617 = vmatprep.subr.bf16.mxu0 %v5884_v41  ;;  %2432 = vrot.lane.b32.xlu0 %v6001_v14, %s5883_s10  ;;  %v305_v44 = vsel %vm285_vm1, %v278_v39, 0 }
  0xa1   : > { %v279_v42 = vsel %vm271_vm0, %v266_v37, %v268_v40  ;;  %2434 = vrot.lane.b32.xlu1 %v6007_v16, %s5883_s10 }
  0xa2   : > { %5414 = vmatmul.mubr.msk.bf16.vlgmr.msra.gmra.mrb[4].mxu0 %vm281_vm2, %v5407_v28  ;;  %5415 = vmatprep.subr.msk.bf16.mxu1 %vm285_vm1, %v279_v42  ;;  %v270_v43 = vpop.permute.xlu1 %269 }
  0xa3   : > { %v280_v45 = vsel %vm271_vm0, %v268_v40, %v270_v43  ;;  %437 = vmatpush1.bf16.msra.mxu1 %v305_v44  ;;  %5619 = vmatprep.mubr.msk.bf16.mxu0 %vm5885_vm3, %v5884_v41  ;;  %vm4705_vm0 = vcmask 171008  }
  0xa4   : > { %v311_v46 = vsel %vm285_vm1, %v280_v45, 0  ;;  %5419 = vmatprep.subr.msk.bf16.mxu1 %vm285_vm1, %v5993_v12  ;;  %2436 = vrot.lane.b32.xlu0 %v6010_v17, %s5883_s10  ;;  %v810_v48 = vpop.permute.xlu0 %809 }
  0xa5   : > { %5618 = vmatpush3.bf16.msra.mxu0 %v311_v46  ;;  %2438 = vrot.lane.b32.xlu1 %v6016_v18, %s5883_s10 }
  0xa6   : > { %5416 = vmatmul.mubr.msk.bf16.vlgmr.msra.gmra.mrb[4].mxu1 %vm281_vm2, %v5407_v28  ;;  %5421 = vmatprep.subr.msk.bf16.mxu0 %vm285_vm1, %v5998_v13  ;;  %v812_v49 = vpop.permute.xlu1 %811 }
  0xa7   : > { %556 = vmatpush1.bf16.msra.mxu1 %v529_v47  ;;  %587 = vmatprep.mubr.bf16.mxu1 %v5876_v6  ;;  %v830_v0 = vsel %vm829_vm4, %v810_v48, %v812_v49 }
  0xa8   : > { %5423 = vmatprep.subr.msk.bf16.mxu1 %vm285_vm1, %v6007_v16  ;;  %2440 = vrot.lane.b32.xlu0 %v6019_v19, %s5883_s10  ;;  %v814_v51 = vpop.permute.xlu0 %813  ;;  %v843_v3 = vsel %vm285_vm1, %v830_v0, 0 }
  0xa9   : > { %2442 = vrot.lane.b32.xlu1 %v6025_v20, %s5883_s10  ;;  %v831_v59 = vsel %vm829_vm4, %v812_v49, %v814_v51  ;;  %s6986_s10 = scalar_lea.hbm %s7039_s3, %s5715_s6 }
  0xaa   : > { %5620 = vmatmul.mubr.msk.bf16.vlgmr.msra.gmra.mrb[8].mxu0 %vm281_vm2, %v5407_v28  ;;  %v816_v52 = vpop.permute.xlu1 %815 }
  0xab   : > { %597 = vmatpush1.bf16.msra.mxu0 %v535_v50  ;;  %628 = vmatprep.mubr.bf16.mxu0 %v5876_v6  ;;  %v832_v7 = vsel %vm829_vm4, %v814_v51, %v816_v52  ;;  %v5439_v51 = vld [vmem:[%s7037_s1 + $0xc] sm:$0xf] }
  0xac   : > { %5425 = vmatprep.subr.msk.bf16.mxu0 %vm285_vm1, %v6016_v18  ;;  %2747 = vrot.lane.b32.xlu0 %v5984_v8, %s5886_s23  ;;  %v818_v55 = vpop.permute.xlu0 %817  ;;  %v849_v15 = vsel %vm285_vm1, %v832_v7, 0 }
  0xad   : > { %2749 = vrot.lane.b32.xlu1 %v5993_v12, %s5886_s23  ;;  %v833_v1 = vsel %vm829_vm4, %v816_v52, %v818_v55 }
  0xae   : > { %5420 = vmatmul.mubr.msk.bf16.vlgmr.msra.gmra.mrb[8].mxu1 %vm281_vm2, %v202_v53  ;;  %v820_v56 = vpop.permute.xlu1 %819 }
  0xaf   : > { %638 = vmatpush1.bf16.msra.mxu1 %v541_v54  ;;  %669 = vmatprep.mubr.bf16.mxu1 %v5876_v6  ;;  %v834_v22 = vsel %vm829_vm4, %v818_v55, %v820_v56 }
  0xb0   : > { %5623 = vmatprep.subr.bf16.mxu1 %v5884_v41  ;;  %2751 = vrot.lane.b32.xlu0 %v5989_v11, %s5886_s23  ;;  %v822_v58 = vpop.permute.xlu0 %821  ;;  %v855_v26 = vsel %vm285_vm1, %v834_v22, 0 }
  0xb1   : > { %2753 = vrot.lane.b32.xlu1 %v5998_v13, %s5886_s23  ;;  %v835_v9 = vsel %vm829_vm4, %v820_v56, %v822_v58 }
  0xb2   : > { %5422 = vmatmul.mubr.msk.bf16.vlgmr.msra.gmra.mrb[12].mxu0 %vm281_vm2, %v202_v53  ;;  %v824_v61 = vpop.permute.xlu1 %823 }
  0xb3   : > { %679 = vmatpush1.bf16.msra.mxu0 %v547_v57  ;;  %710 = vmatprep.mubr.bf16.mxu0 %v5876_v6  ;;  %v836_v28 = vsel %vm829_vm4, %v822_v58, %v824_v61 }
  0xb4   : > { %5430 = vmatprep.subr.msk.bf16.mxu0 %vm285_vm1, %v831_v59  ;;  %2755 = vrot.lane.b32.xlu0 %v6001_v14, %s5886_s23  ;;  %v826_v63 = vpop.permute.xlu0 %825  ;;  %v861_v30 = vsel %vm285_vm1, %v836_v28, 0 }
  0xb5   : > { %2757 = vrot.lane.b32.xlu1 %v6007_v16, %s5886_s23  ;;  %v837_v23 = vsel %vm829_vm4, %v824_v61, %v826_v63 }
  0xb6   : > { %5424 = vmatmul.mubr.msk.bf16.vlgmr.msra.gmra.mrb[12].mxu1 %vm281_vm2, %v202_v53  ;;  %v828_v2 = vpop.permute.xlu1 %827 }
  0xb7   : > { %5624 = vmatpush3.bf16.msra.mxu1 %v553_v62  ;;  %5625 = vmatprep.mubr.msk.bf16.mxu1 %vm5885_vm3, %v5884_v41  ;;  %v838_v32 = vsel %vm829_vm4, %v826_v63, %v828_v2  ;;  %vm5028_vm4 = vcmask 162816  }
  0xb8   : > { %5432 = vmatprep.subr.msk.bf16.mxu1 %vm285_vm1, %v833_v1  ;;  %2759 = vrot.lane.b32.xlu0 %v6010_v17, %s5886_s23  ;;  %v1133_v4 = vpop.permute.xlu0 %1132  ;;  %v867_v35 = vsel %vm285_vm1, %v838_v32, 0 }
  0xb9   : > { %2761 = vrot.lane.b32.xlu1 %v6016_v18, %s5886_s23 }
  0xba   : > { %5426 = vmatmul.mubr.msk.bf16.vlgmr.msra.gmra.mrb[16].mxu0 %vm281_vm2, %v202_v53  ;;  %v1135_v10 = vpop.permute.xlu1 %1134 }
  0xbb   : > { %870 = vmatpush1.bf16.msra.mxu0 %v843_v3  ;;  %901 = vmatprep.mubr.bf16.mxu0 %v5876_v6  ;;  %v1153_v37 = vsel %vm1152_vm5, %v1133_v4, %v1135_v10 }
  0xbc   : > { %5434 = vmatprep.subr.msk.bf16.mxu0 %vm285_vm1, %v835_v9  ;;  %2763 = vrot.lane.b32.xlu0 %v6019_v19, %s5886_s23  ;;  %v1137_v21 = vpop.permute.xlu0 %1136  ;;  %v1166_v40 = vsel %vm285_vm1, %v1153_v37, 0 }
  0xbd   : > { %2765 = vrot.lane.b32.xlu1 %v6025_v20, %s5886_s23  ;;  %v1154_v33 = vsel %vm1152_vm5, %v1135_v10, %v1137_v21 }
  0xbe   : > { %5626 = vmatmul.mubr.msk.bf16.vlgmr.msra.gmra.mrb[16].mxu1 %vm281_vm2, %v202_v53  ;;  %v1139_v24 = vpop.permute.xlu1 %1138 }
  0xbf   : > { %911 = vmatpush1.bf16.msra.mxu1 %v849_v15  ;;  %942 = vmatprep.mubr.bf16.mxu1 %v5876_v6  ;;  %v1155_v43 = vsel %vm1152_vm5, %v1137_v21, %v1139_v24 }
  0xc0   : > { %5436 = vmatprep.subr.msk.bf16.mxu1 %vm285_vm1, %v837_v23  ;;  %3070 = vrot.lane.b32.xlu0 %v5984_v8, %s5887_s28  ;;  %v1141_v27 = vpop.permute.xlu0 %1140  ;;  %v1172_v46 = vsel %vm285_vm1, %v1155_v43, 0 }
  0xc1   : > { %3072 = vrot.lane.b32.xlu1 %v5993_v12, %s5887_s28  ;;  %v1156_v38 = vsel %vm1152_vm5, %v1139_v24, %v1141_v27  ;;  %v5450_v24 = vld [vmem:[%s7037_s1 + $0x10] sm:$0xf] }
  0xc2   : > { %5431 = vmatmul.mubr.msk.bf16.vlgmr.msra.gmra.mrb[20].mxu0 %vm281_vm2, %v5428_v25  ;;  %v1143_v29 = vpop.permute.xlu1 %1142 }
  0xc3   : > { %952 = vmatpush1.bf16.msra.mxu0 %v855_v26  ;;  %983 = vmatprep.mubr.bf16.mxu0 %v5876_v6  ;;  %v1157_v48 = vsel %vm1152_vm5, %v1141_v27, %v1143_v29 }
  0xc4   : > { %5629 = vmatprep.subr.bf16.mxu0 %v5884_v41  ;;  %3074 = vrot.lane.b32.xlu0 %v5989_v11, %s5887_s28  ;;  %v1145_v31 = vpop.permute.xlu0 %1144  ;;  %v1178_v52 = vsel %vm285_vm1, %v1157_v48, 0  ;;  %v3990_v48 = vld [vmem:[%s5979_s30 + $0x8] sm:$0xff] }
  0xc5   : > { %3076 = vrot.lane.b32.xlu1 %v5998_v13, %s5887_s28  ;;  %v1158_v44 = vsel %vm1152_vm5, %v1143_v29, %v1145_v31 }
  0xc6   : > { %5433 = vmatmul.mubr.msk.bf16.vlgmr.msra.gmra.mrb[20].mxu1 %vm281_vm2, %v5428_v25  ;;  %v1147_v34 = vpop.permute.xlu1 %1146 }
  0xc7   : > { %993 = vmatpush1.bf16.msra.mxu1 %v861_v30  ;;  %1024 = vmatprep.mubr.bf16.mxu1 %v5876_v6  ;;  %v1159_v54 = vsel %vm1152_vm5, %v1145_v31, %v1147_v34 }
  0xc8   : > { %5441 = vmatprep.subr.msk.bf16.mxu1 %vm285_vm1, %v1154_v33  ;;  %3078 = vrot.lane.b32.xlu0 %v6001_v14, %s5887_s28  ;;  %v1149_v36 = vpop.permute.xlu0 %1148  ;;  %v1184_v56 = vsel %vm285_vm1, %v1159_v54, 0 }
  0xc9   : > { %3080 = vrot.lane.b32.xlu1 %v6007_v16, %s5887_s28  ;;  %v1160_v49 = vsel %vm1152_vm5, %v1147_v34, %v1149_v36 }
  0xca   : > { %5435 = vmatmul.mubr.msk.bf16.vlgmr.msra.gmra.mrb[24].mxu0 %vm281_vm2, %v5428_v25  ;;  %v1151_v39 = vpop.permute.xlu1 %1150 }
  0xcb   : > { %5630 = vmatpush3.bf16.msra.mxu0 %v867_v35  ;;  %5631 = vmatprep.mubr.msk.bf16.mxu0 %vm5885_vm3, %v5884_v41  ;;  %v1161_v58 = vsel %vm1152_vm5, %v1149_v36, %v1151_v39  ;;  %v3989_v36 = vld [vmem:[%s5979_s30] sm:$0xff] }
  0xcc   : > { %5443 = vmatprep.subr.msk.bf16.mxu0 %vm285_vm1, %v1156_v38  ;;  %3082 = vrot.lane.b32.xlu0 %v6010_v17, %s5887_s28  ;;  %v1456_v42 = vpop.permute.xlu0 %1455  ;;  %v1190_v61 = vsel %vm285_vm1, %v1161_v58, 0  ;;  %v6348_v39 = vrot.slane %v3989_v36, %v5972_v5 }
  0xcd   : > { %3084 = vrot.lane.b32.xlu1 %v6016_v18, %s5887_s28 }
  0xce   : > { %5437 = vmatmul.mubr.msk.bf16.vlgmr.msra.gmra.mrb[24].mxu1 %vm281_vm2, %v5428_v25  ;;  %v1458_v45 = vpop.permute.xlu1 %1457 }
  0xcf   : > { %1193 = vmatpush1.bf16.msra.mxu1 %v1166_v40  ;;  %1224 = vmatprep.mubr.bf16.mxu1 %v5876_v6  ;;  %v1476_v63 = vsel %vm1475_vm6, %v1456_v42, %v1458_v45  ;;  %v3997_v40 = vcombine.high %v3989_v36, %v3989_v36 }
  0xd0   : > { %5445 = vmatprep.subr.msk.bf16.mxu1 %vm285_vm1, %v1158_v44  ;;  %3086 = vrot.lane.b32.xlu0 %v6019_v19, %s5887_s28  ;;  %v1460_v47 = vpop.permute.xlu0 %1459  ;;  %v1489_v2 = vsel %vm285_vm1, %v1476_v63, 0  ;;  %v6360_v44 = vcombine.high %v6348_v39, %v6348_v39 }
  0xd1   : > { %3088 = vrot.lane.b32.xlu1 %v6025_v20, %s5887_s28  ;;  %v1477_v59 = vsel %vm1475_vm6, %v1458_v45, %v1460_v47 }
  0xd2   : > { %5632 = vmatmul.mubr.msk.bf16.vlgmr.msra.gmra.mrb[28].mxu0 %vm281_vm2, %v5428_v25  ;;  %v1462_v50 = vpop.permute.xlu1 %1461 }
  0xd3   : > { %1234 = vmatpush1.bf16.msra.mxu0 %v1172_v46  ;;  %1265 = vmatprep.mubr.bf16.mxu0 %v5876_v6  ;;  %v1478_v4 = vsel %vm1475_vm6, %v1460_v47, %v1462_v50  ;;  %v6370_v46 = vrot.slane %v3997_v40, %v5972_v5 }
  0xd4   : > { %5447 = vmatprep.subr.msk.bf16.mxu0 %vm285_vm1, %v1160_v49  ;;  %3393 = vrot.lane.b32.xlu0 %v5984_v8, %s5888_s5  ;;  %v1464_v53 = vpop.permute.xlu0 %1463  ;;  %v1495_v10 = vsel %vm285_vm1, %v1478_v4, 0  ;;  %v6429_v4 = vld.sshfl [vmem:[%s5979_s30 + $0x10] sm:$0x33 pattern:$0x76325410]  ;;  %s5894_s30 = smov [#allocation2]  }
  0xd5   : > { %3395 = vrot.lane.b32.xlu1 %v5993_v12, %s5888_s5  ;;  %v1479_v0 = vsel %vm1475_vm6, %v1462_v50, %v1464_v53  ;;  %v6382_v50 = vcombine.high %v6370_v46, %v6370_v46  ;;  %s5799_s18 = sshll.u32 %s5894_s30, 4  ;;  %s5800_s18 = int_to_ptr.vmem [resolvable:$false] %s5799_s18 }
  0xd6   : > { %5442 = vmatmul.mubr.msk.bf16.vlgmr.msra.gmra.mrb[28].mxu1 %vm281_vm2, %v5439_v51  ;;  %v1466_v55 = vpop.permute.xlu1 %1465 }
  0xd7   : > { %1275 = vmatpush1.bf16.msra.mxu1 %v1178_v52  ;;  %1306 = vmatprep.mubr.bf16.mxu1 %v5876_v6  ;;  %v1480_v21 = vsel %vm1475_vm6, %v1464_v53, %v1466_v55  ;;  %v6388_v52 = vrot.slane %v3990_v48, %v5972_v5  ;;  %v4014_v53 = vcombine.high %v3990_v48, %v3990_v48 }
  0xd8   : > { %5635 = vmatprep.subr.bf16.mxu1 %v5884_v41  ;;  %3397 = vrot.lane.b32.xlu0 %v5989_v11, %s5888_s5  ;;  %v1468_v57 = vpop.permute.xlu0 %1467  ;;  %v1501_v25 = vsel %vm285_vm1, %v1480_v21, 0 }
  0xd9   : > { %3399 = vrot.lane.b32.xlu1 %v5998_v13, %s5888_s5  ;;  %v1481_v7 = vsel %vm1475_vm6, %v1466_v55, %v1468_v57  ;;  %v6400_v58 = vcombine.high %v6388_v52, %v6388_v52 }
  0xda   : > { %5444 = vmatmul.mubr.msk.bf16.vlgmr.msra.gmra.mrb[32].mxu0 %vm281_vm2, %v5439_v51  ;;  %v1470_v60 = vpop.permute.xlu1 %1469 }
  0xdb   : > { %1316 = vmatpush1.bf16.msra.mxu0 %v1184_v56  ;;  %1347 = vmatprep.mubr.bf16.mxu0 %v5876_v6  ;;  %v1482_v27 = vsel %vm1475_vm6, %v1468_v57, %v1470_v60 }
  0xdc   : > { %5452 = vmatprep.subr.msk.bf16.mxu0 %vm285_vm1, %v1477_v59  ;;  %3401 = vrot.lane.b32.xlu0 %v6001_v14, %s5888_s5  ;;  %v1472_v62 = vpop.permute.xlu0 %1471  ;;  %v1507_v29 = vsel %vm285_vm1, %v1482_v27, 0 }
  0xdd   : > { %3403 = vrot.lane.b32.xlu1 %v6007_v16, %s5888_s5  ;;  %v1483_v22 = vsel %vm1475_vm6, %v1470_v60, %v1472_v62  ;;  %v6406_v60 = vrot.slane %v4014_v53, %v5972_v5 }
  0xde   : > { %5446 = vmatmul.mubr.msk.bf16.vlgmr.msra.gmra.mrb[32].mxu1 %vm281_vm2, %v5439_v51  ;;  %v1474_v1 = vpop.permute.xlu1 %1473 }
  0xdf   : > { %5636 = vmatpush3.bf16.msra.mxu1 %v1190_v61  ;;  %5637 = vmatprep.mubr.msk.bf16.mxu1 %vm5885_vm3, %v5884_v41  ;;  %v1484_v30 = vsel %vm1475_vm6, %v1472_v62, %v1474_v1  ;;  %v6418_v5 = vcombine.high %v6406_v60, %v6406_v60 }
  0xe0   : > { %5454 = vmatprep.subr.msk.bf16.mxu1 %vm285_vm1, %v1479_v0  ;;  %3405 = vrot.lane.b32.xlu0 %v6010_v17, %s5888_s5  ;;  %v1779_v3 = vpop.permute.xlu0 %1778  ;;  %v1513_v32 = vsel %vm285_vm1, %v1484_v30, 0 }
  0xe1   : > { %3407 = vrot.lane.b32.xlu1 %v6016_v18, %s5888_s5 }
  0xe2   : > { %5448 = vmatmul.mubr.msk.bf16.vlgmr.msra.gmra.mrb[36].mxu0 %vm281_vm2, %v5439_v51  ;;  %v1781_v9 = vpop.permute.xlu1 %1780 }
  0xe3   : > { %1516 = vmatpush1.bf16.msra.mxu0 %v1489_v2  ;;  %1547 = vmatprep.mubr.bf16.mxu0 %v5876_v6  ;;  %v1799_v33 = vsel %vm1798_vm7, %v1779_v3, %v1781_v9 }
  0xe4   : > { %5456 = vmatprep.subr.msk.bf16.mxu0 %vm285_vm1, %v1481_v7  ;;  %3409 = vrot.lane.b32.xlu0 %v6019_v19, %s5888_s5  ;;  %v1783_v15 = vpop.permute.xlu0 %1782  ;;  %v1812_v35 = vsel %vm285_vm1, %v1799_v33, 0 }
  0xe5   : > { %3411 = vrot.lane.b32.xlu1 %v6025_v20, %s5888_s5  ;;  %v1800_v31 = vsel %vm1798_vm7, %v1781_v9, %v1783_v15 }
  0xe6   : > { %5638 = vmatmul.mubr.msk.bf16.vlgmr.msra.gmra.mrb[36].mxu1 %vm281_vm2, %v5439_v51  ;;  %v1785_v23 = vpop.permute.xlu1 %1784 }
  0xe7   : > { %1557 = vmatpush1.bf16.msra.mxu1 %v1495_v10  ;;  %1588 = vmatprep.mubr.bf16.mxu1 %v5876_v6  ;;  %v1801_v37 = vsel %vm1798_vm7, %v1783_v15, %v1785_v23  ;;  %v6435_v10 = vcombine.high %v6429_v4, %v6429_v4 }
  0xe8   : > { %5458 = vmatprep.subr.msk.bf16.mxu1 %vm285_vm1, %v1483_v22  ;;  %3716 = vrot.lane.b32.xlu0 %v5984_v8, %s5889_s8  ;;  %v1787_v26 = vpop.permute.xlu0 %1786 }
  0xe9   : > { %3718 = vrot.lane.b32.xlu1 %v5993_v12, %s5889_s8  ;;  %v1802_v34 = vsel %vm1798_vm7, %v1785_v23, %v1787_v26 }
  0xea   : > { %5453 = vmatmul.mubr.msk.bf16.vlgmr.msra.gmra.mrb[40].mxu0 %vm281_vm2, %v5450_v24  ;;  %v1789_v28 = vpop.permute.xlu1 %1788 }
  0xeb   : > { %1598 = vmatpush1.bf16.msra.mxu0 %v1501_v25  ;;  %1629 = vmatprep.mubr.bf16.mxu0 %v5876_v6 }
  0xec   : > { %5641 = vmatprep.subr.bf16.mxu0 %v5884_v41  ;;  %3720 = vrot.lane.b32.xlu0 %v5989_v11, %s5889_s8  ;;  %v1791_v8 = vpop.permute.xlu0 %1790 }
  0xed   : > { %3722 = vrot.lane.b32.xlu1 %v5998_v13, %s5889_s8 }
  0xee   : > { %5455 = vmatmul.mubr.msk.bf16.vlgmr.msra.gmra.mrb[40].mxu1 %vm281_vm2, %v5450_v24  ;;  %v1793_v12 = vpop.permute.xlu1 %1792 }
  0xef   : > { %1639 = vmatpush1.bf16.msra.mxu1 %v1507_v29  ;;  %1670 = vmatprep.mubr.bf16.mxu1 %v5876_v6  ;;  %v1805_v49 = vsel %vm1798_vm7, %v1791_v8, %v1793_v12 }
  0xf0   : > { %5463 = vmatprep.subr.msk.bf16.mxu1 %vm285_vm1, %v1800_v31  ;;  %3724 = vrot.lane.b32.xlu0 %v6001_v14, %s5889_s8  ;;  %v1795_v11 = vpop.permute.xlu0 %1794  ;;  %v1830_v54 = vsel %vm285_vm1, %v1805_v49, 0 }
  0xf1   : > { %3726 = vrot.lane.b32.xlu1 %v6007_v16, %s5889_s8  ;;  %v1804_v16 = vsel %vm1798_vm7, %v1789_v28, %v1791_v8  ;;  %v1806_v43 = vsel %vm1798_vm7, %v1793_v12, %v1795_v11 }
  0xf2   : > { %5457 = vmatmul.mubr.msk.bf16.vlgmr.msra.gmra.mrb[44].mxu0 %vm281_vm2, %v5450_v24  ;;  %v1797_v13 = vpop.permute.xlu1 %1796 }
  0xf3   : > { %5642 = vmatpush3.bf16.msra.mxu0 %v1513_v32  ;;  %5643 = vmatprep.mubr.msk.bf16.mxu0 %vm5885_vm3, %v5884_v41  ;;  %v1807_v56 = vsel %vm1798_vm7, %v1795_v11, %v1797_v13 }
  0xf4   : > { %5465 = vmatprep.subr.msk.bf16.mxu0 %vm285_vm1, %v1802_v34  ;;  %3728 = vrot.lane.b32.xlu0 %v6010_v17, %s5889_s8  ;;  %v2102_v14 = vpop.permute.xlu0 %2101  ;;  %v1818_v17 = vsel %vm285_vm1, %v1801_v37, 0  ;;  %v1836_v61 = vsel %vm285_vm1, %v1807_v56, 0 }
  0xf5   : > { %3730 = vrot.lane.b32.xlu1 %v6016_v18, %s5889_s8  ;;  %v1803_v18 = vsel %vm1798_vm7, %v1787_v26, %v1789_v28  ;;  %v5472_v26 = vld [vmem:[%s7037_s1 + $0x18] sm:$0xf] }
  0xf6   : > { %5459 = vmatmul.mubr.msk.bf16.vlgmr.msra.gmra.mrb[44].mxu1 %vm281_vm2, %v5450_v24  ;;  %v2104_v38 = vpop.permute.xlu1 %2103 }
  0xf7   : > { %1839 = vmatpush1.bf16.msra.mxu1 %v1812_v35  ;;  %1870 = vmatprep.mubr.bf16.mxu1 %v5876_v6  ;;  %v2122_v63 = vsel %vm2121_vm8, %v2102_v14, %v2104_v38 }
  0xf8   : > { %5467 = vmatprep.subr.msk.bf16.mxu1 %vm285_vm1, %v1804_v16  ;;  %3732 = vrot.lane.b32.xlu0 %v6019_v19, %s5889_s8  ;;  %v2106_v42 = vpop.permute.xlu0 %2105  ;;  %v6366_v19 = vld [vmem:[%s7037_s1 + $0x14] sm:$0xf]  ;;  %v2135_v2 = vsel %vm285_vm1, %v2122_v63, 0 }
  0xf9   : > { %3734 = vrot.lane.b32.xlu1 %v6025_v20, %s5889_s8  ;;  %v1824_v20 = vsel %vm285_vm1, %v1803_v18, 0  ;;  %v2123_v57 = vsel %vm2121_vm8, %v2104_v38, %v2106_v42 }
  0xfa   : > { %5644 = vmatmul.mubr.msk.bf16.vlgmr.msra.gmra.mrb[48].mxu0 %vm281_vm2, %v5450_v24  ;;  %v2108_v45 = vpop.permute.xlu1 %2107 }
  0xfb   : > { %1880 = vmatpush1.bf16.msra.mxu0 %v1818_v17  ;;  %1911 = vmatprep.mubr.bf16.mxu0 %v5876_v6  ;;  %v2124_v7 = vsel %vm2121_vm8, %v2106_v42, %v2108_v45 }
  0xfc   : > { %5469 = vmatprep.subr.msk.bf16.mxu0 %vm285_vm1, %v1806_v43  ;;  %4039 = vrot.lane.b32.xlu0 %v6348_v39, %s5890_s11  ;;  %v2110_v47 = vpop.permute.xlu0 %2109  ;;  %v2141_v21 = vsel %vm285_vm1, %v2124_v7, 0 }
  0xfd   : > { %4041 = vrot.lane.b32.xlu1 %v6360_v44, %s5890_s11  ;;  %v2125_v0 = vsel %vm2121_vm8, %v2108_v45, %v2110_v47  ;;  %v5483_v45 = vld [vmem:[%s7037_s1 + $0x1c] sm:$0xf] }
  0xfe   : > { %5464 = vmatmul.mubr.msk.bf16.vlgmr.msra.gmra.mrb[48].mxu1 %vm281_vm2, %v6366_v19  ;;  %v2112_v51 = vpop.permute.xlu1 %2111 }
  0xff   : > { %1921 = vmatpush1.bf16.msra.mxu1 %v1824_v20  ;;  %1952 = vmatprep.mubr.bf16.mxu1 %v5876_v6  ;;  %v2126_v22 = vsel %vm2121_vm8, %v2110_v47, %v2112_v51 }
 0x100   : > { %5647 = vmatprep.subr.bf16.mxu1 %v5884_v41  ;;  %4043 = vrot.lane.b32.xlu0 %v6370_v46, %s5890_s11  ;;  %v2114_v55 = vpop.permute.xlu0 %2113  ;;  %v2147_v27 = vsel %vm285_vm1, %v2126_v22, 0 }
 0x101   : > { %4045 = vrot.lane.b32.xlu1 %v6382_v50, %s5890_s11  ;;  %v2127_v9 = vsel %vm2121_vm8, %v2112_v51, %v2114_v55 }
 0x102   : > { %5466 = vmatmul.mubr.msk.bf16.vlgmr.msra.gmra.mrb[52].mxu0 %vm281_vm2, %v6366_v19  ;;  %v2116_v59 = vpop.permute.xlu1 %2115 }
 0x103   : > { %1962 = vmatpush1.bf16.msra.mxu0 %v1830_v54  ;;  %1993 = vmatprep.mubr.bf16.mxu0 %v5876_v6  ;;  %v2128_v28 = vsel %vm2121_vm8, %v2114_v55, %v2116_v59 }
 0x104   : > { %5474 = vmatprep.subr.msk.bf16.mxu0 %vm285_vm1, %v2123_v57  ;;  %4047 = vrot.lane.b32.xlu0 %v6388_v52, %s5890_s11  ;;  %v2118_v62 = vpop.permute.xlu0 %2117  ;;  %v2153_v30 = vsel %vm285_vm1, %v2128_v28, 0 }
 0x105   : > { %4049 = vrot.lane.b32.xlu1 %v6400_v58, %s5890_s11  ;;  %v2129_v23 = vsel %vm2121_vm8, %v2116_v59, %v2118_v62 }
 0x106   : > { %5468 = vmatmul.mubr.msk.bf16.vlgmr.msra.gmra.mrb[52].mxu1 %vm281_vm2, %v6366_v19  ;;  %v2120_v1 = vpop.permute.xlu1 %2119 }
 0x107   : > { %5648 = vmatpush3.bf16.msra.mxu1 %v1836_v61  ;;  %5649 = vmatprep.mubr.msk.bf16.mxu1 %vm5885_vm3, %v5884_v41  ;;  %v2130_v31 = vsel %vm2121_vm8, %v2118_v62, %v2120_v1 }
 0x108   : > { %5476 = vmatprep.subr.msk.bf16.mxu1 %vm285_vm1, %v2125_v0  ;;  %4051 = vrot.lane.b32.xlu0 %v6406_v60, %s5890_s11  ;;  %v2425_v3 = vpop.permute.xlu0 %2424  ;;  %v2159_v33 = vsel %vm285_vm1, %v2130_v31, 0 }
 0x109   : > { %4053 = vrot.lane.b32.xlu1 %v6418_v5, %s5890_s11 }
 0x10a   : > { %5470 = vmatmul.mubr.msk.bf16.vlgmr.msra.gmra.mrb[56].mxu0 %vm281_vm2, %v6366_v19  ;;  %v2427_v15 = vpop.permute.xlu1 %2426 }
 0x10b   : > { %2162 = vmatpush1.bf16.msra.mxu0 %v2135_v2  ;;  %2193 = vmatprep.mubr.bf16.mxu0 %v5876_v6  ;;  %v2445_v34 = vsel %vm2444_vm9, %v2425_v3, %v2427_v15 }
 0x10c   : > { %5478 = vmatprep.subr.msk.bf16.mxu0 %vm285_vm1, %v2127_v9  ;;  %4055 = vrot.lane.b32.xlu0 %v6429_v4, %s5890_s11  ;;  %v2458_v36 = vsel %vm285_vm1, %v2445_v34, 0 }
 0x10d   : > { %4057 = vrot.lane.b32.xlu1 %v6435_v10, %s5890_s11 }
 0x10e   : > { %5650 = vmatmul.mubr.msk.bf16.vlgmr.msra.gmra.mrb[56].mxu1 %vm281_vm2, %v6366_v19  ;;  %v2429_v24 = vpop.permute.xlu0 %2428  ;;  %v2431_v25 = vpop.permute.xlu1 %2430 }
 0x10f   : > { %2203 = vmatpush1.bf16.msra.mxu1 %v2141_v21  ;;  %2234 = vmatprep.mubr.bf16.mxu1 %v5876_v6  ;;  %v2446_v12 = vsel %vm2444_vm9, %v2427_v15, %v2429_v24  ;;  %v2447_v37 = vsel %vm2444_vm9, %v2429_v24, %v2431_v25 }
 0x110   : > { %5480 = vmatprep.subr.msk.bf16.mxu1 %vm285_vm1, %v2129_v23  ;;  %4362 = vrot.lane.b32.xlu0 %v6348_v39, %s5891_s19  ;;  %v2464_v17 = vsel %vm285_vm1, %v2447_v37, 0  ;;  %v5494_v23 = vld [vmem:[%s7037_s1 + $0x20] sm:$0xf] }
 0x111   : > { %4364 = vrot.lane.b32.xlu1 %v6360_v44, %s5891_s19 }
 0x112   : > { %5475 = vmatmul.mubr.msk.bf16.vlgmr.msra.gmra.mrb[60].mxu0 %vm281_vm2, %v5472_v26  ;;  %v2433_v29 = vpop.permute.xlu0 %2432 }
 0x113   : > { %2244 = vmatpush1.bf16.msra.mxu0 %v2147_v27  ;;  %2275 = vmatprep.mubr.bf16.mxu0 %v5876_v6  ;;  %v2435_v8 = vpop.permute.xlu1 %2434  ;;  %v2448_v13 = vsel %vm2444_vm9, %v2431_v25, %v2433_v29 }
 0x114   : > { %5653 = vmatprep.subr.bf16.mxu0 %v5884_v41  ;;  %4366 = vrot.lane.b32.xlu0 %v6370_v46, %s5891_s19  ;;  %v2449_v42 = vsel %vm2444_vm9, %v2433_v29, %v2435_v8 }
 0x115   : > { %4368 = vrot.lane.b32.xlu1 %v6382_v50, %s5891_s19  ;;  %v2470_v20 = vsel %vm285_vm1, %v2449_v42, 0 }
 0x116   : > { %5477 = vmatmul.mubr.msk.bf16.vlgmr.msra.gmra.mrb[60].mxu1 %vm281_vm2, %v5472_v26  ;;  %v2437_v32 = vpop.permute.xlu0 %2436 }
 0x117   : > { %2285 = vmatpush1.bf16.msra.mxu1 %v2153_v30  ;;  %2316 = vmatprep.mubr.bf16.mxu1 %v5876_v6  ;;  %v2439_v11 = vpop.permute.xlu1 %2438  ;;  %v2450_v16 = vsel %vm2444_vm9, %v2435_v8, %v2437_v32 }
 0x118   : > { %5485 = vmatprep.subr.msk.bf16.mxu1 %vm285_vm1, %v2446_v12  ;;  %4370 = vrot.lane.b32.xlu0 %v6388_v52, %s5891_s19  ;;  %v2451_v47 = vsel %vm2444_vm9, %v2437_v32, %v2439_v11 }
 0x119   : > { %4372 = vrot.lane.b32.xlu1 %v6400_v58, %s5891_s19  ;;  %v2476_v51 = vsel %vm285_vm1, %v2451_v47, 0 }
 0x11a   : > { %5479 = vmatmul.mubr.msk.bf16.vlgmr.msra.gmra.mrb[64].mxu0 %vm281_vm2, %v5472_v26  ;;  %v2441_v35 = vpop.permute.xlu0 %2440 }
 0x11b   : > { %5654 = vmatpush3.bf16.msra.mxu0 %v2159_v33  ;;  %5655 = vmatprep.mubr.msk.bf16.mxu0 %vm5885_vm3, %v5884_v41  ;;  %v2443_v14 = vpop.permute.xlu1 %2442  ;;  %v2452_v18 = vsel %vm2444_vm9, %v2439_v11, %v2441_v35 }
 0x11c   : > { %5487 = vmatprep.subr.msk.bf16.mxu0 %vm285_vm1, %v2448_v13  ;;  %4374 = vrot.lane.b32.xlu0 %v6406_v60, %s5891_s19  ;;  %v2453_v53 = vsel %vm2444_vm9, %v2441_v35, %v2443_v14  ;;  %v5505_v14 = vld [vmem:[%s7037_s1 + $0x24] sm:$0xf] }
 0x11d   : > { %4376 = vrot.lane.b32.xlu1 %v6418_v5, %s5891_s19  ;;  %v2482_v57 = vsel %vm285_vm1, %v2453_v53, 0 }
 0x11e   : > { %5481 = vmatmul.mubr.msk.bf16.vlgmr.msra.gmra.mrb[64].mxu1 %vm281_vm2, %v5472_v26  ;;  %v2748_v38 = vpop.permute.xlu0 %2747 }
 0x11f   : > { %2485 = vmatpush1.bf16.msra.mxu1 %v2458_v36  ;;  %2516 = vmatprep.mubr.bf16.mxu1 %v5876_v6  ;;  %v2750_v40 = vpop.permute.xlu1 %2749 }
 0x120   : > { %5489 = vmatprep.subr.msk.bf16.mxu1 %vm285_vm1, %v2450_v16  ;;  %4378 = vrot.lane.b32.xlu0 %v6429_v4, %s5891_s19  ;;  %v2768_v59 = vsel %vm2767_vm10, %v2748_v38, %v2750_v40 }
 0x121   : > { %4380 = vrot.lane.b32.xlu1 %v6435_v10, %s5891_s19  ;;  %v2781_v0 = vsel %vm285_vm1, %v2768_v59, 0  ;;  %s5801_s19 = scalar_lea.vmem %s5800_s18, 2304 }
 0x122   : > { %5656 = vmatmul.mubr.msk.bf16.vlgmr.msra.gmra.mrb[68].mxu0 %vm281_vm2, %v5472_v26  ;;  %v2752_v43 = vpop.permute.xlu0 %2751 }
 0x123   : > { %2526 = vmatpush1.bf16.msra.mxu0 %v2464_v17  ;;  %2557 = vmatprep.mubr.bf16.mxu0 %v5876_v6  ;;  %v2754_v19 = vpop.permute.xlu1 %2753  ;;  %v2769_v54 = vsel %vm2767_vm10, %v2750_v40, %v2752_v43 }
 0x124   : > { %5491 = vmatprep.subr.msk.bf16.mxu0 %vm285_vm1, %v2452_v18  ;;  %4685 = vrot.lane.b32.xlu0 %v6348_v39, %s5892_s26  ;;  %v2770_v1 = vsel %vm2767_vm10, %v2752_v43, %v2754_v19 }
 0x125   : > { %4687 = vrot.lane.b32.xlu1 %v6360_v44, %s5892_s26  ;;  %v2787_v9 = vsel %vm285_vm1, %v2770_v1, 0 }
 0x126   : > { %5486 = vmatmul.mubr.msk.bf16.vlgmr.msra.gmra.mrb[68].mxu1 %vm281_vm2, %v5483_v45  ;;  %v2756_v48 = vpop.permute.xlu0 %2755 }
 0x127   : > { %2567 = vmatpush1.bf16.msra.mxu1 %v2470_v20  ;;  %2598 = vmatprep.mubr.bf16.mxu1 %v5876_v6  ;;  %v2758_v49 = vpop.permute.xlu1 %2757  ;;  %v2771_v61 = vsel %vm2767_vm10, %v2754_v19, %v2756_v48 }
 0x128   : > { %5659 = vmatprep.subr.bf16.mxu1 %v5884_v41  ;;  %4689 = vrot.lane.b32.xlu0 %v6370_v46, %s5892_s26  ;;  %v2772_v15 = vsel %vm2767_vm10, %v2756_v48, %v2758_v49 }
 0x129   : > { %4691 = vrot.lane.b32.xlu1 %v6382_v50, %s5892_s26  ;;  %v2793_v25 = vsel %vm285_vm1, %v2772_v15, 0 }
 0x12a   : > { %5488 = vmatmul.mubr.msk.bf16.vlgmr.msra.gmra.mrb[72].mxu0 %vm281_vm2, %v5483_v45  ;;  %v2760_v55 = vpop.permute.xlu0 %2759 }
 0x12b   : > { %2608 = vmatpush1.bf16.msra.mxu0 %v2476_v51  ;;  %2639 = vmatprep.mubr.bf16.mxu0 %v5876_v6  ;;  %v2762_v56 = vpop.permute.xlu1 %2761  ;;  %v2773_v2 = vsel %vm2767_vm10, %v2758_v49, %v2760_v55 }
 0x12c   : > { %5496 = vmatprep.subr.msk.bf16.mxu0 %vm285_vm1, %v2769_v54  ;;  %4693 = vrot.lane.b32.xlu0 %v6388_v52, %s5892_s26  ;;  %v2774_v26 = vsel %vm2767_vm10, %v2760_v55, %v2762_v56 }
 0x12d   : > { %4695 = vrot.lane.b32.xlu1 %v6400_v58, %s5892_s26  ;;  %v2799_v29 = vsel %vm285_vm1, %v2774_v26, 0 }
 0x12e   : > { %5490 = vmatmul.mubr.msk.bf16.vlgmr.msra.gmra.mrb[72].mxu1 %vm281_vm2, %v5483_v45  ;;  %v2764_v62 = vpop.permute.xlu0 %2763 }
 0x12f   : > { %5660 = vmatpush3.bf16.msra.mxu1 %v2482_v57  ;;  %5661 = vmatprep.mubr.msk.bf16.mxu1 %vm5885_vm3, %v5884_v41  ;;  %v2766_v63 = vpop.permute.xlu1 %2765  ;;  %v2775_v21 = vsel %vm2767_vm10, %v2762_v56, %v2764_v62 }
 0x130   : > { %5498 = vmatprep.subr.msk.bf16.mxu1 %vm285_vm1, %v2771_v61  ;;  %4697 = vrot.lane.b32.xlu0 %v6406_v60, %s5892_s26  ;;  %v5516_v61 = vld [vmem:[%s7037_s1 + $0x28] sm:$0xf] }
 0x131   : > { %4699 = vrot.lane.b32.xlu1 %v6418_v5, %s5892_s26 }
 0x132   : > { %5492 = vmatmul.mubr.msk.bf16.vlgmr.msra.gmra.mrb[76].mxu0 %vm281_vm2, %v5483_v45  ;;  %v3071_v3 = vpop.permute.xlu0 %3070 }
 0x133   : > { %2808 = vmatpush1.bf16.msra.mxu0 %v2781_v0  ;;  %2839 = vmatprep.mubr.bf16.mxu0 %v5876_v6  ;;  %v3073_v7 = vpop.permute.xlu1 %3072 }
 0x134   : > { %5500 = vmatprep.subr.msk.bf16.mxu0 %vm285_vm1, %v2773_v2  ;;  %4701 = vrot.lane.b32.xlu0 %v6429_v4, %s5892_s26 }
 0x135   : > { %4703 = vrot.lane.b32.xlu1 %v6435_v10, %s5892_s26 }
 0x136   : > { %5662 = vmatmul.mubr.msk.bf16.vlgmr.msra.gmra.mrb[76].mxu1 %vm281_vm2, %v5483_v45  ;;  %v3075_v22 = vpop.permute.xlu0 %3074 }
 0x137   : > { %2849 = vmatpush1.bf16.msra.mxu1 %v2787_v9  ;;  %2880 = vmatprep.mubr.bf16.mxu1 %v5876_v6  ;;  %v3077_v24 = vpop.permute.xlu1 %3076  ;;  %v3092_v8 = vsel %vm3090_vm11, %v3073_v7, %v3075_v22 }
 0x138   : > { %5502 = vmatprep.subr.msk.bf16.mxu1 %vm285_vm1, %v2775_v21  ;;  %5008 = vrot.lane.b32.xlu0 %v6348_v39, %s5893_s29  ;;  %v2776_v39 = vsel %vm2767_vm10, %v2764_v62, %v2766_v63 }
 0x139   : > { %5010 = vrot.lane.b32.xlu1 %v6360_v44, %s5893_s29  ;;  %v2805_v31 = vsel %vm285_vm1, %v2776_v39, 0 }
 0x13a   : > { %5497 = vmatmul.mubr.msk.bf16.vlgmr.msra.gmra.mrb[80].mxu0 %vm281_vm2, %v5494_v23  ;;  %v3079_v27 = vpop.permute.xlu0 %3078 }
 0x13b   : > { %2890 = vmatpush1.bf16.msra.mxu0 %v2793_v25  ;;  %2921 = vmatprep.mubr.bf16.mxu0 %v5876_v6  ;;  %v3081_v28 = vpop.permute.xlu1 %3080  ;;  %v3094_v12 = vsel %vm3090_vm11, %v3077_v24, %v3079_v27 }
 0x13c   : > { %5665 = vmatprep.subr.bf16.mxu0 %v5884_v41  ;;  %5012 = vrot.lane.b32.xlu0 %v6370_v46, %s5893_s29  ;;  %v3091_v46 = vsel %vm3090_vm11, %v3071_v3, %v3073_v7 }
 0x13d   : > { %5014 = vrot.lane.b32.xlu1 %v6382_v50, %s5893_s29  ;;  %v3104_v11 = vsel %vm285_vm1, %v3091_v46, 0 }
 0x13e   : > { %5499 = vmatmul.mubr.msk.bf16.vlgmr.msra.gmra.mrb[80].mxu1 %vm281_vm2, %v5494_v23  ;;  %v3083_v44 = vpop.permute.xlu0 %3082 }
 0x13f   : > { %2931 = vmatpush1.bf16.msra.mxu1 %v2799_v29  ;;  %2962 = vmatprep.mubr.bf16.mxu1 %v5876_v6  ;;  %v3085_v30 = vpop.permute.xlu1 %3084  ;;  %v3096_v33 = vsel %vm3090_vm11, %v3081_v28, %v3083_v44 }
 0x140   : > { %5507 = vmatprep.subr.msk.bf16.mxu1 %vm285_vm1, %v3092_v8  ;;  %5016 = vrot.lane.b32.xlu0 %v6388_v52, %s5893_s29  ;;  %v3093_v52 = vsel %vm3090_vm11, %v3075_v22, %v3077_v24  ;;  %v3097_v37 = vsel %vm3090_vm11, %v3083_v44, %v3085_v30 }
 0x141   : > { %5018 = vrot.lane.b32.xlu1 %v6400_v58, %s5893_s29  ;;  %v3110_v13 = vsel %vm285_vm1, %v3093_v52, 0  ;;  %v3122_v38 = vsel %vm285_vm1, %v3097_v37, 0 }
 0x142   : > { %5501 = vmatmul.mubr.msk.bf16.vlgmr.msra.gmra.mrb[84].mxu0 %vm281_vm2, %v5494_v23  ;;  %v3087_v50 = vpop.permute.xlu0 %3086 }
 0x143   : > { %5666 = vmatpush3.bf16.msra.mxu0 %v2805_v31  ;;  %5667 = vmatprep.mubr.msk.bf16.mxu0 %vm5885_vm3, %v5884_v41  ;;  %v3089_v32 = vpop.permute.xlu1 %3088  ;;  %v3098_v35 = vsel %vm3090_vm11, %v3085_v30, %v3087_v50 }
 0x144   : > { %5509 = vmatprep.subr.msk.bf16.mxu0 %vm285_vm1, %v3094_v12  ;;  %5020 = vrot.lane.b32.xlu0 %v6406_v60, %s5893_s29  ;;  %v3095_v60 = vsel %vm3090_vm11, %v3079_v27, %v3081_v28  ;;  %v3099_v40 = vsel %vm3090_vm11, %v3087_v50, %v3089_v32 }
 0x145   : > { %5022 = vrot.lane.b32.xlu1 %v6418_v5, %s5893_s29  ;;  %v3128_v43 = vsel %vm285_vm1, %v3099_v40, 0 }
 0x146   : > { %5503 = vmatmul.mubr.msk.bf16.vlgmr.msra.gmra.mrb[84].mxu1 %vm281_vm2, %v5494_v23  ;;  %v3394_v58 = vpop.permute.xlu0 %3393 }
 0x147   : > { %3131 = vmatpush1.bf16.msra.mxu1 %v3104_v11  ;;  %3162 = vmatprep.mubr.bf16.mxu1 %v5876_v6  ;;  %v3396_v34 = vpop.permute.xlu1 %3395 }
 0x148   : > { %5511 = vmatprep.subr.msk.bf16.mxu1 %vm285_vm1, %v3096_v33  ;;  %5024 = vrot.lane.b32.xlu0 %v6429_v4, %s5893_s29  ;;  %v3116_v4 = vsel %vm285_vm1, %v3095_v60, 0  ;;  %v3414_v45 = vsel %vm3413_vm12, %v3394_v58, %v3396_v34 }
 0x149   : > { %5026 = vrot.lane.b32.xlu1 %v6435_v10, %s5893_s29  ;;  %v3427_v48 = vsel %vm285_vm1, %v3414_v45, 0  ;;  %s185_s29 = sand.u32 1, %s5857_s13  }
 0x14a   : > { %5668 = vmatmul.mubr.msk.bf16.vlgmr.msra.gmra.mrb[88].mxu0 %vm281_vm2, %v5494_v23  ;;  %v3398_v5 = vpop.permute.xlu0 %3397  ;;  %s5713_s4 = smul.u32 72, %s185_s29  ;;  %s5306_s15 = scalar_lea.sflag [#allocation3], %s185_s29 }
 0x14b   : > { %3172 = vmatpush1.bf16.msra.mxu0 %v3110_v13  ;;  %3203 = vmatprep.mubr.bf16.mxu0 %v5876_v6  ;;  %v3400_v36 = vpop.permute.xlu1 %3399  ;;  %v3415_v17 = vsel %vm3413_vm12, %v3396_v34, %v3398_v5  ;;  %v6688_v34 = vld [vmem:[%s7037_s1 + $0x2c] sm:$0xf] }
 0x14c   : > { %5513 = vmatprep.subr.msk.bf16.mxu0 %vm285_vm1, %v3098_v35  ;;  %v3416_v49 = vsel %vm3413_vm12, %v3398_v5, %v3400_v36  ;;  %s6971_s5 = scalar_lea.vmem [#allocation2], %s5713_s4 }
 0x14d   : > { %v3433_v55 = vsel %vm285_vm1, %v3416_v49, 0  ;;  %s5322_s7 = sshll.u32 %s6971_s5, 4  ;;  %s6988_s7 = int_to_ptr.vmem [resolvable:$true] %s5322_s7 }
 0x14e   : > { %5508 = vmatmul.mubr.msk.bf16.vlgmr.msra.gmra.mrb[88].mxu1 %vm281_vm2, %v5505_v14  ;;  %v3402_v10 = vpop.permute.xlu0 %3401  ;;  %s5795_s11 = scalar_lea.vmem %s6988_s7, 1152  ;;  %p5802_p1 = scmp.lt.s32.totalorder %s6988_s7, %s5800_s18 }
 0x14f   : > { %3213 = vmatpush1.bf16.msra.mxu1 %v3116_v4  ;;  %3244 = vmatprep.mubr.bf16.mxu1 %v5876_v6  ;;  %v3404_v16 = vpop.permute.xlu1 %3403  ;;  %v3417_v19 = vsel %vm3413_vm12, %v3400_v36, %v3402_v10  ;;  %p5796_p12 = scmp.ne.s32.totalorder %s6988_s7, %s5795_s11  ;;  %p5803_p2 = scmp.lt.s32.totalorder %s5801_s19, %s5795_s11 }
 0x150   : > { %5671 = vmatprep.subr.bf16.mxu1 %v5884_v41  ;;  %v3418_v56 = vsel %vm3413_vm12, %v3402_v10, %v3404_v16 }
 0x151   : > { %v3439_v63 = vsel %vm285_vm1, %v3418_v56, 0  ;;  %p5797_p13 = pnand %p5796_p12, %p5955_p4  ;;  %p5804_p3 = por %p5803_p2, %p5802_p1 }
 0x152   : > { %5510 = vmatmul.mubr.msk.bf16.vlgmr.msra.gmra.mrb[92].mxu0 %vm281_vm2, %v5505_v14  ;;  %v3406_v42 = vpop.permute.xlu0 %3405 }
 0x153   : > { %3254 = vmatpush1.bf16.msra.mxu0 %v3122_v38  ;;  %3285 = vmatprep.mubr.bf16.mxu0 %v5876_v6  ;;  %v3408_v18 = vpop.permute.xlu1 %3407  ;;  %v3419_v51 = vsel %vm3413_vm12, %v3404_v16, %v3406_v42  ;;  %p5798_p0 = pneg %p5797_p13 }
 0x154   : > { %5518 = vmatprep.subr.msk.bf16.mxu0 %vm285_vm1, %v3415_v17  ;;  %v3420_v0 = vsel %vm3413_vm12, %v3406_v42, %v3408_v18 }
 0x155   : > { %v3445_v3 = vsel %vm285_vm1, %v3420_v0, 0  ;;  %p5805_p5 = pnand %p5804_p3, %p5798_p0 }
 0x156   : > { %5512 = vmatmul.mubr.msk.bf16.vlgmr.msra.gmra.mrb[92].mxu1 %vm281_vm2, %v5505_v14  ;;  %v3410_v20 = vpop.permute.xlu0 %3409 }
 0x157   : > { %5672 = vmatpush3.bf16.msra.mxu1 %v3128_v43  ;;  %5673 = vmatprep.mubr.msk.bf16.mxu1 %vm5885_vm3, %v5884_v41  ;;  %v3412_v47 = vpop.permute.xlu1 %3411  ;;  %v3421_v57 = vsel %vm3413_vm12, %v3408_v18, %v3410_v20 }
 0x158   : > { %5520 = vmatprep.subr.msk.bf16.mxu1 %vm285_vm1, %v3417_v19  ;;  %v3422_v7 = vsel %vm3413_vm12, %v3410_v20, %v3412_v47 }
 0x159   : > { %v3451_v22 = vsel %vm285_vm1, %v3422_v7, 0 }
 0x15a   : > { %5514 = vmatmul.mubr.msk.bf16.vlgmr.msra.gmra.mrb[96].mxu0 %vm281_vm2, %v5505_v14  ;;  %v3717_v53 = vpop.permute.xlu0 %3716 }
 0x15b   : > { %3454 = vmatpush1.bf16.msra.mxu0 %v3427_v48  ;;  %3485 = vmatprep.mubr.bf16.mxu0 %v5876_v6  ;;  %v3719_v54 = vpop.permute.xlu1 %3718 }
 0x15c   : > { %5522 = vmatprep.subr.msk.bf16.mxu0 %vm285_vm1, %v3419_v51  ;;  %v3737_v23 = vsel %vm3736_vm13, %v3717_v53, %v3719_v54 }
 0x15d   : > { %v3750_v27 = vsel %vm285_vm1, %v3737_v23, 0 }
 0x15e   : > { %5674 = vmatmul.mubr.msk.bf16.vlgmr.msra.gmra.mrb[96].mxu1 %vm281_vm2, %v5505_v14  ;;  %v3721_v59 = vpop.permute.xlu0 %3720 }
 0x15f   : > { %3495 = vmatpush1.bf16.msra.mxu1 %v3433_v55  ;;  %3526 = vmatprep.mubr.bf16.mxu1 %v5876_v6  ;;  %v3723_v62 = vpop.permute.xlu1 %3722  ;;  %v3738_v9 = vsel %vm3736_vm13, %v3719_v54, %v3721_v59 }
 0x160   : > { %5524 = vmatprep.subr.msk.bf16.mxu1 %vm285_vm1, %v3421_v57  ;;  %v3739_v28 = vsel %vm3736_vm13, %v3721_v59, %v3723_v62 }
 0x161   : > { %v3756_v46 = vsel %vm285_vm1, %v3739_v28, 0 }
 0x162   : > { %5519 = vmatmul.mubr.msk.bf16.vlgmr.msra.gmra.mrb[100].mxu0 %vm281_vm2, %v5516_v61  ;;  %v3725_v1 = vpop.permute.xlu0 %3724 }
 0x163   : > { %3536 = vmatpush1.bf16.msra.mxu0 %v3439_v63  ;;  %3567 = vmatprep.mubr.bf16.mxu0 %v5876_v6  ;;  %v3727_v2 = vpop.permute.xlu1 %3726  ;;  %v3740_v24 = vsel %vm3736_vm13, %v3723_v62, %v3725_v1 }
 0x164   : > { %5677 = vmatprep.subr.bf16.mxu0 %v5884_v41  ;;  %v3741_v32 = vsel %vm3736_vm13, %v3725_v1, %v3727_v2 }
 0x165   : > { %v3762_v60 = vsel %vm285_vm1, %v3741_v32, 0 }
 0x166   : > { %5521 = vmatmul.mubr.msk.bf16.vlgmr.msra.gmra.mrb[100].mxu1 %vm281_vm2, %v5516_v61  ;;  %v3729_v15 = vpop.permute.xlu0 %3728 }
 0x167   : > { %3577 = vmatpush1.bf16.msra.mxu1 %v3445_v3  ;;  %3608 = vmatprep.mubr.bf16.mxu1 %v5876_v6  ;;  %v3731_v21 = vpop.permute.xlu1 %3730  ;;  %v3742_v39 = vsel %vm3736_vm13, %v3727_v2, %v3729_v15 }
 0x168   : > { %5529 = vmatprep.subr.msk.bf16.mxu1 %vm285_vm1, %v3738_v9  ;;  %v3743_v5 = vsel %vm3736_vm13, %v3729_v15, %v3731_v21 }
 0x169   : > { %v3768_v16 = vsel %vm285_vm1, %v3743_v5, 0 }
 0x16a   : > { %5523 = vmatmul.mubr.msk.bf16.vlgmr.msra.gmra.mrb[104].mxu0 %vm281_vm2, %v5516_v61  ;;  %v3733_v25 = vpop.permute.xlu0 %3732 }
 0x16b   : > { %5678 = vmatpush3.bf16.msra.mxu0 %v3451_v22  ;;  %5679 = vmatprep.mubr.msk.bf16.mxu0 %vm5885_vm3, %v5884_v41  ;;  %v3735_v26 = vpop.permute.xlu1 %3734  ;;  %v3744_v11 = vsel %vm3736_vm13, %v3731_v21, %v3733_v25 }
 0x16c   : > { %5531 = vmatprep.subr.msk.bf16.mxu0 %vm285_vm1, %v3740_v24  ;;  %v3745_v17 = vsel %vm3736_vm13, %v3733_v25, %v3735_v26 }
 0x16d   : > { %v6669_v29 = vpop.f32.mrb[0].mxu0  ;;  %v3774_v20 = vsel %vm285_vm1, %v3745_v17, 0 }
 0x16e   : > { %5525 = vmatmul.mubr.msk.bf16.vlgmr.msra.gmra.mrb[104].mxu1 %vm281_vm2, %v5516_v61  ;;  %v6673_v8 = vpop.f32.mrb[1].mxu0  ;;  %v4040_v44 = vpop.permute.xlu0 %4039 }
 0x16f   : > { %3777 = vmatpush1.bf16.msra.mxu1 %v3750_v27  ;;  %v351_v30 = vpop.f32.mrb[2].mxu0  ;;  %3808 = vmatprep.mubr.bf16.mxu1 %v5876_v6  ;;  %v4042_v31 = vpop.permute.xlu1 %4041 }
 0x170   : > { %v352_v12 = vpop.f32.mrb[3].mxu0  ;;  %5533 = vmatprep.subr.msk.bf16.mxu1 %vm285_vm1, %v3742_v39  ;;  %v4060_v48 = vsel %vm4059_vm14, %v4040_v44, %v4042_v31 }
 0x171   : > { %v6678_v50 = vpop.f32.mrb[0].mxu1  ;;  %v4073_v57 = vsel %vm285_vm1, %v4060_v48, 0 }
 0x172   : > { %5680 = vmatmul.mubr.msk.bf16.vlgmr.msra.gmra.mrb[108].mxu0 %vm281_vm2, %v5516_v61  ;;  %v6683_v52 = vpop.f32.mrb[1].mxu1  ;;  %v4044_v33 = vpop.permute.xlu0 %4043 }
 0x173   : > { %3818 = vmatpush1.bf16.msra.mxu0 %v3756_v46  ;;  %v392_v58 = vpop.f32.mrb[2].mxu1  ;;  %3849 = vmatprep.mubr.bf16.mxu0 %v5876_v6  ;;  %v4046_v13 = vpop.permute.xlu1 %4045  ;;  %v4061_v42 = vsel %vm4059_vm14, %v4042_v31, %v4044_v33 }
 0x174   : > { %v393_v35 = vpop.f32.mrb[3].mxu1  ;;  %5535 = vmatprep.subr.msk.bf16.mxu0 %vm285_vm1, %v3744_v11  ;;  %v4062_v62 = vsel %vm4059_vm14, %v4044_v33, %v4046_v13 }
 0x175   : > { %v6694_v14 = vpop.f32.mrb[4].mxu0  ;;  %v4079_v15 = vsel %vm285_vm1, %v4062_v62, 0 }
 0x176   : > { %5530 = vmatmul.mubr.msk.bf16.vlgmr.msra.gmra.mrb[108].mxu1 %vm281_vm2, %v6688_v34  ;;  %v6698_v36 = vpop.f32.mrb[5].mxu0  ;;  %v4048_v4 = vpop.permute.xlu0 %4047 }
 0x177   : > { %3859 = vmatpush1.bf16.msra.mxu1 %v3762_v60  ;;  %v433_v37 = vpop.f32.mrb[6].mxu0  ;;  %3890 = vmatprep.mubr.bf16.mxu1 %v5876_v6  ;;  %v4050_v10 = vpop.permute.xlu1 %4049  ;;  %v4063_v51 = vsel %vm4059_vm14, %v4046_v13, %v4048_v4 }
 0x178   : > { %v434_v38 = vpop.f32.mrb[7].mxu0  ;;  %5683 = vmatprep.subr.bf16.mxu1 %v5884_v41  ;;  %v4064_v23 = vsel %vm4059_vm14, %v4048_v4, %v4050_v10 }
 0x179   : > { %v6703_v40 = vpop.f32.mrb[4].mxu1  ;;  %v4085_v44 = vsel %vm285_vm1, %v4064_v23, 0 }
 0x17a   : > { %5532 = vmatmul.mubr.msk.bf16.vlgmr.msra.gmra.mrb[112].mxu0 %vm281_vm2, %v6688_v34  ;;  %v6709_v18 = vpop.f32.mrb[5].mxu1  ;;  %v4052_v43 = vpop.permute.xlu0 %4051 }
 0x17b   : > { %3900 = vmatpush1.bf16.msra.mxu0 %v3768_v16  ;;  %v474_v45 = vpop.f32.mrb[6].mxu1  ;;  %3931 = vmatprep.mubr.bf16.mxu0 %v5876_v6  ;;  %v4054_v19 = vpop.permute.xlu1 %4053  ;;  %v4065_v63 = vsel %vm4059_vm14, %v4050_v10, %v4052_v43 }
 0x17c   : > { %v475_v47 = vpop.f32.mrb[7].mxu1  ;;  %5540 = vmatprep.subr.msk.bf16.mxu0 %vm285_vm1, %v4061_v42  ;;  %v4066_v46 = vsel %vm4059_vm14, %v4052_v43, %v4054_v19 }
 0x17d   : > { %v6715_v49 = vpop.f32.mrb[8].mxu0  ;;  %v4091_v58 = vsel %vm285_vm1, %v4066_v46, 0 }
 0x17e   : > { %5534 = vmatmul.mubr.msk.bf16.vlgmr.msra.gmra.mrb[112].mxu1 %vm281_vm2, %v6688_v34  ;;  %v5621_v53 = vpop.f32.mrb[9].mxu0  ;;  %v4056_v54 = vpop.permute.xlu0 %4055 }
 0x17f   : > { %5684 = vmatpush3.bf16.msra.mxu1 %v3774_v20  ;;  %v514_v55 = vpop.f32.mrb[10].mxu0  ;;  %5685 = vmatprep.mubr.msk.bf16.mxu1 %vm5885_vm3, %v5884_v41  ;;  %v4058_v56 = vpop.permute.xlu1 %4057  ;;  %v4067_v24 = vsel %vm4059_vm14, %v4054_v19, %v4056_v54 }
 0x180   : > { %v5622_v59 = vpop.f32.mrb[11].mxu0  ;;  %5542 = vmatprep.subr.msk.bf16.mxu1 %vm285_vm1, %v4063_v51  ;;  %v4068_v60 = vsel %vm4059_vm14, %v4056_v54, %v4058_v56 }
 0x181   : > { %v589_v61 = vpop.f32.mrb[8].mxu1  ;;  %v4097_v16 = vsel %vm285_vm1, %v4068_v60, 0 }
 0x182   : > { %v6727_v0 = vadd.f32 %v589_v61, %v6669_v29  ;;  %v591_v1 = vpop.f32.mrb[9].mxu1  ;;  %5536 = vmatmul.mubr.msk.bf16.vlgmr.msra.gmra.mrb[116].mxu0 %vm281_vm2, %v6688_v34  ;;  %v4363_v2 = vpop.permute.xlu0 %4362  ;;  %v6750_v29 = vld [vmem:[%s7037_s1 + $0x30] sm:$0xf] }
 0x183   : > { %v6732_v3 = vadd.f32 %v591_v1, %v6673_v8  ;;  %4100 = vmatpush1.bf16.msra.mxu0 %v4073_v57  ;;  %v593_v7 = vpop.f32.mrb[10].mxu1  ;;  %4131 = vmatprep.mubr.bf16.mxu0 %v5876_v6  ;;  %v4365_v9 = vpop.permute.xlu1 %4364 }
 0x184   : > { %v594_v21 = vpop.f32.mrb[11].mxu1  ;;  %5544 = vmatprep.subr.msk.bf16.mxu0 %vm285_vm1, %v4065_v63  ;;  %v4383_v17 = vsel %vm4382_vm15, %v4363_v2, %v4365_v9 }
 0x185   : > { %v630_v22 = vpop.f32.mrb[12].mxu0  ;;  %v4396_v47 = vsel %vm285_vm1, %v4383_v17, 0 }
 0x186   : > { %v6740_v25 = vadd.f32 %v630_v22, %v6678_v50  ;;  %v632_v26 = vpop.f32.mrb[13].mxu0  ;;  %5686 = vmatmul.mubr.msk.bf16.vlgmr.msra.gmra.mrb[116].mxu1 %vm281_vm2, %v6688_v34  ;;  %v4367_v27 = vpop.permute.xlu0 %4366  ;;  %v6817_v22 = vld [vmem:[%s7037_s1 + $0x34] sm:$0xf] }
 0x187   : > { %v6745_v28 = vadd.f32 %v632_v26, %v6683_v52  ;;  %4141 = vmatpush1.bf16.msra.mxu1 %v4079_v15  ;;  %v634_v39 = vpop.f32.mrb[14].mxu0  ;;  %4172 = vmatprep.mubr.bf16.mxu1 %v5876_v6  ;;  %v4369_v8 = vpop.permute.xlu1 %4368  ;;  %v4384_v35 = vsel %vm4382_vm15, %v4365_v9, %v4367_v27 }
 0x188   : > { %v635_v30 = vpop.f32.mrb[15].mxu0  ;;  %5546 = vmatprep.subr.msk.bf16.mxu1 %vm285_vm1, %v4067_v24  ;;  %v5281_v24 = vld [vmem:[%s7038_s2] sm:$0xff] }
 0x189   : > { %v671_v31 = vpop.f32.mrb[12].mxu1  ;;  %5284 = vperm.xlu0 %5790, %v5281_v24  }
 0x18a   : > { %v6757_v12 = vadd.f32 %v671_v31, %v6694_v14  ;;  %v673_v50 = vpop.f32.mrb[13].mxu1  ;;  %5541 = vmatmul.mubr.msk.bf16.vlgmr.msra.gmra.mrb[120].mxu0 %vm281_vm2, %v6750_v29  ;;  %v4371_v32 = vpop.permute.xlu0 %4370 }
 0x18b   : > { %v6762_v11 = vadd.f32 %v673_v50, %v6698_v36  ;;  %4182 = vmatpush1.bf16.msra.mxu0 %v4085_v44  ;;  %v675_v52 = vpop.f32.mrb[14].mxu1  ;;  %4213 = vmatprep.mubr.bf16.mxu0 %v5876_v6  ;;  %v4373_v33 = vpop.permute.xlu1 %4372  ;;  %v4386_v42 = vsel %vm4382_vm15, %v4369_v8, %v4371_v32 }
 0x18c   : > { %v676_v34 = vpop.f32.mrb[15].mxu1  ;;  %5689 = vmatprep.subr.bf16.mxu0 %v5884_v41  ;;  %v4387_v1 = vsel %vm4382_vm15, %v4371_v32, %v4373_v33 }
 0x18d   : > { %v712_v13 = vpop.f32.mrb[16].mxu0 }
 0x18e   : > { %v6770_v5 = vadd.f32 %v712_v13, %v6703_v40  ;;  %v714_v14 = vpop.f32.mrb[17].mxu0  ;;  %5543 = vmatmul.mubr.msk.bf16.vlgmr.msra.gmra.mrb[120].mxu1 %vm281_vm2, %v6750_v29  ;;  %v4375_v36 = vpop.permute.xlu0 %4374 }
 0x18f   : > { %v6775_v4 = vadd.f32 %v714_v14, %v6709_v18  ;;  %4223 = vmatpush1.bf16.msra.mxu1 %v4091_v58  ;;  %v716_v37 = vpop.f32.mrb[18].mxu0  ;;  %4254 = vmatprep.mubr.bf16.mxu1 %v5876_v6  ;;  %v4377_v10 = vpop.permute.xlu1 %4376  ;;  %v4388_v53 = vsel %vm4382_vm15, %v4373_v33, %v4375_v36 }
 0x190   : > { %v717_v38 = vpop.f32.mrb[19].mxu0  ;;  %5551 = vmatprep.subr.msk.bf16.mxu1 %vm285_vm1, %v4384_v35 }
 0x191   : > { %v753_v40 = vpop.f32.mrb[16].mxu1 }
 0x192   : > { %v6783_v43 = vadd.f32 %v753_v40, %v6715_v49  ;;  %5545 = vmatmul.mubr.msk.bf16.vlgmr.msra.gmra.mrb[124].mxu0 %vm281_vm2, %v6750_v29  ;;  %v5627_v18 = vpop.f32.mrb[17].mxu1  ;;  %v4379_v45 = vpop.permute.xlu0 %4378  ;;  %v4385_v49 = vsel %vm4382_vm15, %v4367_v27, %v4369_v8 }
 0x193   : > { %5690 = vmatpush3.bf16.msra.mxu0 %v4097_v16  ;;  %v756_v19 = vpop.f32.mrb[18].mxu1  ;;  %5691 = vmatprep.mubr.msk.bf16.mxu0 %vm5885_vm3, %v5884_v41  ;;  %v4381_v20 = vpop.permute.xlu1 %4380  ;;  %v4402_v62 = vsel %vm285_vm1, %v4385_v49, 0  ;;  %v4390_v2 = vsel %vm4382_vm15, %v4377_v10, %v4379_v45 }
 0x194   : > { %v5628_v48 = vpop.f32.mrb[19].mxu1  ;;  %5553 = vmatprep.subr.msk.bf16.mxu0 %vm285_vm1, %v4386_v42  ;;  %v4391_v32 = vsel %vm4382_vm15, %v4379_v45, %v4381_v20 }
 0x195   : > { %v903_v51 = vpop.f32.mrb[20].mxu0  ;;  %v4420_v35 = vsel %vm285_vm1, %v4391_v32, 0 }
 0x196   : > { %v6794_v54 = vadd.f32 %v903_v51, %v6727_v0  ;;  %v905_v55 = vpop.f32.mrb[21].mxu0  ;;  %5547 = vmatmul.mubr.msk.bf16.vlgmr.msra.gmra.mrb[124].mxu1 %vm281_vm2, %v6750_v29  ;;  %v4686_v56 = vpop.permute.xlu0 %4685 }
 0x197   : > { %v6799_v57 = vadd.f32 %v905_v55, %v6732_v3  ;;  %4423 = vmatpush1.bf16.msra.mxu1 %v4396_v47  ;;  %v907_v59 = vpop.f32.mrb[22].mxu0  ;;  %4454 = vmatprep.mubr.bf16.mxu1 %v5876_v6  ;;  %v4688_v61 = vpop.permute.xlu1 %4687 }
 0x198   : > { %v908_v63 = vpop.f32.mrb[23].mxu0  ;;  %5555 = vmatprep.subr.msk.bf16.mxu1 %vm285_vm1, %v4388_v53 }
 0x199   : > { %v944_v0 = vpop.f32.mrb[20].mxu1 }
 0x19a   : > { %v6807_v7 = vadd.f32 %v944_v0, %v6740_v25  ;;  %v946_v3 = vpop.f32.mrb[21].mxu1  ;;  %5692 = vmatmul.mubr.msk.bf16.vlgmr.msra.gmra.mrb[128].mxu0 %vm281_vm2, %v6750_v29  ;;  %v4690_v9 = vpop.permute.xlu0 %4689  ;;  %v4408_v25 = vsel %vm285_vm1, %v4387_v1, 0  ;;  %v6887_v0 = vld [vmem:[%s7037_s1 + $0x38] sm:$0xf] }
 0x19b   : > { %v6812_v15 = vadd.f32 %v946_v3, %v6745_v28  ;;  %4464 = vmatpush1.bf16.msra.mxu0 %v4402_v62  ;;  %v948_v21 = vpop.f32.mrb[22].mxu1  ;;  %4495 = vmatprep.mubr.bf16.mxu0 %v5876_v6  ;;  %v4692_v23 = vpop.permute.xlu1 %4691  ;;  %v4389_v28 = vsel %vm4382_vm15, %v4375_v36, %v4377_v10  ;;  %v4707_v52 = vsel %vm4705_vm0, %v4688_v61, %v4690_v9 }
 0x19c   : > { %v949_v26 = vpop.f32.mrb[23].mxu1  ;;  %5557 = vmatprep.subr.msk.bf16.mxu0 %vm285_vm1, %v4390_v2  ;;  %v4414_v46 = vsel %vm285_vm1, %v4389_v28, 0  ;;  %v4706_v36 = vsel %vm4705_vm0, %v4686_v56, %v4688_v61 }
 0x19d   : > { %v985_v27 = vpop.f32.mrb[24].mxu0  ;;  %v4719_v17 = vsel %vm285_vm1, %v4706_v36, 0 }
 0x19e   : > { %v6827_v29 = vadd.f32 %v985_v27, %v6757_v12  ;;  %v987_v39 = vpop.f32.mrb[25].mxu0  ;;  %5552 = vmatmul.mubr.msk.bf16.vlgmr.msra.gmra.mrb[128].mxu1 %vm281_vm2, %v6817_v22  ;;  %v4694_v8 = vpop.permute.xlu0 %4693 }
 0x19f   : > { %v6832_v44 = vadd.f32 %v987_v39, %v6762_v11  ;;  %4505 = vmatpush1.bf16.msra.mxu1 %v4408_v25  ;;  %v989_v30 = vpop.f32.mrb[26].mxu0  ;;  %4536 = vmatprep.mubr.bf16.mxu1 %v5876_v6  ;;  %v4696_v31 = vpop.permute.xlu1 %4695  ;;  %v4709_v37 = vsel %vm4705_vm0, %v4692_v23, %v4694_v8 }
 0x1a0   : > { %v990_v50 = vpop.f32.mrb[27].mxu0  ;;  %5695 = vmatprep.subr.bf16.mxu1 %v5884_v41  ;;  %v4710_v56 = vsel %vm4705_vm0, %v4694_v8, %v4696_v31 }
 0x1a1   : > { %v1026_v12 = vpop.f32.mrb[24].mxu1  ;;  %v4731_v2 = vsel %vm285_vm1, %v4710_v56, 0 }
 0x1a2   : > { %v6840_v33 = vadd.f32 %v1026_v12, %v6770_v5  ;;  %v1028_v11 = vpop.f32.mrb[25].mxu1  ;;  %5554 = vmatmul.mubr.msk.bf16.vlgmr.msra.gmra.mrb[132].mxu0 %vm281_vm2, %v6817_v22  ;;  %v4698_v58 = vpop.permute.xlu0 %4697 }
 0x1a3   : > { %v6845_v34 = vadd.f32 %v1028_v11, %v6775_v4  ;;  %4546 = vmatpush1.bf16.msra.mxu0 %v4414_v46  ;;  %v1030_v13 = vpop.f32.mrb[26].mxu1  ;;  %4577 = vmatprep.mubr.bf16.mxu0 %v5876_v6  ;;  %v4700_v60 = vpop.permute.xlu1 %4699  ;;  %v4711_v45 = vsel %vm4705_vm0, %v4696_v31, %v4698_v58 }
 0x1a4   : > { %v1031_v14 = vpop.f32.mrb[27].mxu1  ;;  %5562 = vmatprep.subr.msk.bf16.mxu0 %vm285_vm1, %v4707_v52 }
 0x1a5   : > { %v1067_v5 = vpop.f32.mrb[28].mxu0 }
 0x1a6   : > { %v6853_v10 = vadd.f32 %v1067_v5, %v6783_v43  ;;  %5556 = vmatmul.mubr.msk.bf16.vlgmr.msra.gmra.mrb[132].mxu1 %vm281_vm2, %v6817_v22  ;;  %v5633_v4 = vpop.f32.mrb[29].mxu0  ;;  %v4702_v16 = vpop.permute.xlu0 %4701  ;;  %v4708_v43 = vsel %vm4705_vm0, %v4690_v9, %v4692_v23  ;;  %v4712_v9 = vsel %vm4705_vm0, %v4698_v58, %v4700_v60 }
 0x1a7   : > { %5696 = vmatpush3.bf16.msra.mxu1 %v4420_v35  ;;  %v1070_v38 = vpop.f32.mrb[30].mxu0  ;;  %5697 = vmatprep.mubr.msk.bf16.mxu1 %vm5885_vm3, %v5884_v41  ;;  %v4704_v40 = vpop.permute.xlu1 %4703  ;;  %v4725_v53 = vsel %vm285_vm1, %v4708_v43, 0  ;;  %v4713_v59 = vsel %vm4705_vm0, %v4700_v60, %v4702_v16  ;;  %v4737_v26 = vsel %vm285_vm1, %v4712_v9, 0 }
 0x1a8   : > { %v5634_v42 = vpop.f32.mrb[31].mxu0  ;;  %5564 = vmatprep.subr.msk.bf16.mxu1 %vm285_vm1, %v4709_v37 }
 0x1a9   : > { %v1226_v18 = vpop.f32.mrb[28].mxu1 }
 0x1aa   : > { %v6864_v19 = vadd.f32 %v1226_v18, %v6794_v54  ;;  %v1228_v20 = vpop.f32.mrb[29].mxu1  ;;  %5558 = vmatmul.mubr.msk.bf16.vlgmr.msra.gmra.mrb[136].mxu0 %vm281_vm2, %v6817_v22  ;;  %v5009_v47 = vpop.permute.xlu0 %5008 }
 0x1ab   : > { %v6869_v48 = vadd.f32 %v1228_v20, %v6799_v57  ;;  %4746 = vmatpush1.bf16.msra.mxu0 %v4719_v17  ;;  %v1230_v51 = vpop.f32.mrb[30].mxu1  ;;  %4777 = vmatprep.mubr.bf16.mxu0 %v5876_v6  ;;  %v5011_v49 = vpop.permute.xlu1 %5010 }
 0x1ac   : > { %v1231_v55 = vpop.f32.mrb[31].mxu1  ;;  %5566 = vmatprep.subr.msk.bf16.mxu0 %vm285_vm1, %v4711_v45  ;;  %v5571_v51 = vld [vmem:[%s7037_s1 + $0x3c] sm:$0xf] }
 0x1ad   : > { %v1267_v54 = vpop.f32.mrb[32].mxu0 }
 0x1ae   : > { %v6877_v61 = vadd.f32 %v1267_v54, %v6807_v7  ;;  %v1269_v57 = vpop.f32.mrb[33].mxu0  ;;  %5698 = vmatmul.mubr.msk.bf16.vlgmr.msra.gmra.mrb[136].mxu1 %vm281_vm2, %v6817_v22  ;;  %v5013_v62 = vpop.permute.xlu0 %5012 }
 0x1af   : > { %v6882_v63 = vadd.f32 %v1269_v57, %v6812_v15  ;;  %4787 = vmatpush1.bf16.msra.mxu1 %v4725_v53  ;;  %v1271_v1 = vpop.f32.mrb[34].mxu0  ;;  %4818 = vmatprep.mubr.bf16.mxu1 %v5876_v6  ;;  %v5015_v21 = vpop.permute.xlu1 %5014  ;;  %v5030_v39 = vsel %vm5028_vm4, %v5011_v49, %v5013_v62 }
 0x1b0   : > { %v1272_v7 = vpop.f32.mrb[35].mxu0  ;;  %5568 = vmatprep.subr.msk.bf16.mxu1 %vm285_vm1, %v4713_v59  ;;  %v5031_v5 = vsel %vm5028_vm4, %v5013_v62, %v5015_v21 }
 0x1b1   : > { %v1308_v3 = vpop.f32.mrb[32].mxu1  ;;  %v5048_v17 = vsel %vm285_vm1, %v5031_v5, 0 }
 0x1b2   : > { %v6894_v15 = vadd.f32 %v1308_v3, %v6827_v29  ;;  %v1310_v22 = vpop.f32.mrb[33].mxu1  ;;  %5563 = vmatmul.mubr.msk.bf16.vlgmr.msra.gmra.mrb[140].mxu0 %vm281_vm2, %v6887_v0  ;;  %v5017_v23 = vpop.permute.xlu0 %5016  ;;  %v4714_v29 = vsel %vm4705_vm0, %v4702_v16, %v4704_v40 }
 0x1b3   : > { %v6899_v24 = vadd.f32 %v1310_v22, %v6832_v44  ;;  %4828 = vmatpush1.bf16.msra.mxu0 %v4731_v2  ;;  %v1312_v25 = vpop.f32.mrb[34].mxu1  ;;  %4859 = vmatprep.mubr.bf16.mxu0 %v5876_v6  ;;  %v5019_v46 = vpop.permute.xlu1 %5018  ;;  %v4743_v50 = vsel %vm285_vm1, %v4714_v29, 0  ;;  %v5032_v11 = vsel %vm5028_vm4, %v5015_v21, %v5017_v23 }
 0x1b4   : > { %v1313_v27 = vpop.f32.mrb[35].mxu1  ;;  %5701 = vmatprep.subr.bf16.mxu0 %v5884_v41  ;;  %v5033_v43 = vsel %vm5028_vm4, %v5017_v23, %v5019_v46 }
 0x1b5   : > { %v1349_v28 = vpop.f32.mrb[36].mxu0 }
 0x1b6   : > { %v6907_v8 = vadd.f32 %v1349_v28, %v6840_v33  ;;  %v1351_v30 = vpop.f32.mrb[37].mxu0  ;;  %5565 = vmatmul.mubr.msk.bf16.vlgmr.msra.gmra.mrb[140].mxu1 %vm281_vm2, %v6887_v0  ;;  %v5021_v32 = vpop.permute.xlu0 %5020  ;;  %v5029_v33 = vsel %vm5028_vm4, %v5009_v47, %v5011_v49  ;;  %v5054_v49 = vsel %vm285_vm1, %v5033_v43, 0 }
 0x1b7   : > { %v6912_v44 = vadd.f32 %v1351_v30, %v6845_v34  ;;  %4869 = vmatpush1.bf16.msra.mxu1 %v4737_v26  ;;  %v1353_v31 = vpop.f32.mrb[38].mxu0  ;;  %4900 = vmatprep.mubr.bf16.mxu1 %v5876_v6  ;;  %v5042_v60 = vsel %vm285_vm1, %v5029_v33, 0  ;;  %v5034_v36 = vsel %vm5028_vm4, %v5019_v46, %v5021_v32  ;;  %v5023_v37 = vpop.permute.xlu1 %5022 }
 0x1b8   : > { %v1354_v12 = vpop.f32.mrb[39].mxu0  ;;  %5573 = vmatprep.subr.msk.bf16.mxu1 %vm285_vm1, %v5030_v39  ;;  %v5035_v54 = vsel %vm5028_vm4, %v5021_v32, %v5023_v37 }
 0x1b9   : > { %v1390_v52 = vpop.f32.mrb[36].mxu1 }
 0x1ba   : > { %v6920_v58 = vadd.f32 %v1390_v52, %v6853_v10  ;;  %5567 = vmatmul.mubr.msk.bf16.vlgmr.msra.gmra.mrb[144].mxu0 %vm281_vm2, %v6887_v0  ;;  %v5639_v34 = vpop.f32.mrb[37].mxu1  ;;  %v5025_v16 = vpop.permute.xlu0 %5024 }
 0x1bb   : > { %5702 = vmatpush3.bf16.msra.mxu0 %v4743_v50  ;;  %v1393_v13 = vpop.f32.mrb[38].mxu1  ;;  %5703 = vmatprep.mubr.msk.bf16.mxu0 %vm5885_vm3, %v5884_v41  ;;  %v5036_v45 = vsel %vm5028_vm4, %v5023_v37, %v5025_v16 }
 0x1bc   : > { %v5640_v35 = vpop.f32.mrb[39].mxu1  ;;  %5575 = vmatprep.subr.msk.bf16.mxu0 %vm285_vm1, %v5032_v11 }
 0x1bd   : > { %v1549_v14 = vpop.f32.mrb[40].mxu0 }
 0x1be   : > { %v1719_v10 = vadd.f32 %v1549_v14, %v6864_v19  ;;  %v1551_v4 = vpop.f32.mrb[41].mxu0  ;;  %5569 = vmatmul.mubr.msk.bf16.vlgmr.msra.gmra.mrb[144].mxu1 %vm281_vm2, %v6887_v0 }
 0x1bf   : > { %v1720_v38 = vadd.f32 %v1551_v4, %v6869_v48  ;;  %5069 = vmatpush1.bf16.msra.mxu1 %v5042_v60  ;;  %v1553_v40 = vpop.f32.mrb[42].mxu0  ;;  %5100 = vmatprep.mubr.bf16.mxu1 %v5876_v6 }
 0x1c0   : > { %v1554_v42 = vpop.f32.mrb[43].mxu0  ;;  %5577 = vmatprep.subr.msk.bf16.mxu1 %vm285_vm1, %v5034_v36 }
 0x1c1   : > { %v1590_v18 = vpop.f32.mrb[40].mxu1 }
 0x1c2   : > { %v1721_v19 = vadd.f32 %v1590_v18, %v6877_v61  ;;  %v1592_v20 = vpop.f32.mrb[41].mxu1  ;;  %5704 = vmatmul.mubr.msk.bf16.vlgmr.msra.gmra.mrb[148].mxu0 %vm281_vm2, %v6887_v0  ;;  %v5027_v61 = vpop.permute.xlu1 %5026 }
 0x1c3   : > { %v1722_v47 = vadd.f32 %v1592_v20, %v6882_v63  ;;  %5110 = vmatpush1.bf16.msra.mxu0 %v5048_v17  ;;  %v1594_v48 = vpop.f32.mrb[42].mxu1  ;;  %5141 = vmatprep.mubr.bf16.mxu0 %v5876_v6  ;;  %v5060_v63 = vsel %vm285_vm1, %v5035_v54, 0  ;;  %v5037_v2 = vsel %vm5028_vm4, %v5025_v16, %v5027_v61 }
 0x1c4   : > { %v1595_v53 = vpop.f32.mrb[43].mxu1  ;;  %5579 = vmatprep.subr.msk.bf16.mxu0 %vm285_vm1, %v5036_v45  ;;  %v5066_v22 = vsel %vm285_vm1, %v5037_v2, 0 }
 0x1c5   : > { %v1631_v55 = vpop.f32.mrb[44].mxu0 }
 0x1c6   : > { %v1723_v56 = vadd.f32 %v1631_v55, %v6894_v15  ;;  %v1633_v59 = vpop.f32.mrb[45].mxu0  ;;  %5574 = vmatmul.mubr.msk.bf16.vlgmr.msra.gmra.mrb[148].mxu1 %vm281_vm2, %v5571_v51 }
 0x1c7   : > { %v1724_v57 = vadd.f32 %v1633_v59, %v6899_v24  ;;  %5151 = vmatpush1.bf16.msra.mxu1 %v5054_v49  ;;  %v1635_v62 = vpop.f32.mrb[46].mxu0  ;;  %5182 = vmatprep.mubr.bf16.mxu1 %v5876_v6 }
 0x1c8   : > { %v1636_v0 = vpop.f32.mrb[47].mxu0  ;;  %5707 = vmatprep.subr.bf16.mxu1 %v5884_v41 }
 0x1c9   : > { %v1672_v1 = vpop.f32.mrb[44].mxu1 }
 0x1ca   : > { %v1725_v7 = vadd.f32 %v1672_v1, %v6907_v8  ;;  %v1674_v3 = vpop.f32.mrb[45].mxu1  ;;  %5576 = vmatmul.mubr.msk.bf16.vlgmr.msra.gmra.mrb[152].mxu0 %vm281_vm2, %v5571_v51 }
 0x1cb   : > { %v1726_v9 = vadd.f32 %v1674_v3, %v6912_v44  ;;  %5192 = vmatpush1.bf16.msra.mxu0 %v5060_v63  ;;  %v1676_v21 = vpop.f32.mrb[46].mxu1  ;;  %5223 = vmatprep.mubr.bf16.mxu0 %v5876_v6 }
 0x1cc   : > { %v1677_v15 = vpop.f32.mrb[47].mxu1 }
 0x1cd   : > { %v1713_v23 = vpop.f32.mrb[48].mxu0 }
 0x1ce   : > { %v1727_v24 = vadd.f32 %v1713_v23, %v6920_v58  ;;  %5578 = vmatmul.mubr.msk.bf16.vlgmr.msra.gmra.mrb[152].mxu1 %vm281_vm2, %v5571_v51  ;;  %v5645_v25 = vpop.f32.mrb[49].mxu0 }
 0x1cf   : > { %5708 = vmatpush3.bf16.msra.mxu1 %v5066_v22  ;;  %v1716_v26 = vpop.f32.mrb[50].mxu0  ;;  %5709 = vmatprep.mubr.msk.bf16.mxu1 %vm5885_vm3, %v5884_v41 }
 0x1d0   : > { %v5646_v27 = vpop.f32.mrb[51].mxu0 }
 0x1d1   : > { %v1872_v28 = vpop.f32.mrb[48].mxu1 }
 0x1d2   : > { %v2042_v29 = vadd.f32 %v1872_v28, %v1719_v10  ;;  %v1874_v39 = vpop.f32.mrb[49].mxu1  ;;  %5580 = vmatmul.mubr.msk.bf16.vlgmr.msra.gmra.mrb[156].mxu0 %vm281_vm2, %v5571_v51 }
 0x1d3   : > { %v2043_v6 = vadd.f32 %v1874_v39, %v1720_v38  ;;  %v1876_v8 = vpop.f32.mrb[50].mxu1 }
 0x1d4   : > { %v1877_v30 = vpop.f32.mrb[51].mxu1 }
 0x1d5   : > { %v1913_v44 = vpop.f32.mrb[52].mxu0 }
 0x1d6   : > { %v2044_v31 = vadd.f32 %v1913_v44, %v1721_v19  ;;  %v1915_v46 = vpop.f32.mrb[53].mxu0  ;;  %5710 = vmatmul.mubr.msk.bf16.vlgmr.msra.gmra.mrb[156].mxu1 %vm281_vm2, %v5571_v51 }
 0x1d7   : > { %v2045_v50 = vadd.f32 %v1915_v46, %v1722_v47  ;;  %v1917_v12 = vpop.f32.mrb[54].mxu0 }
 0x1d8   : > { %v1918_v32 = vpop.f32.mrb[55].mxu0 }
 0x1d9   : > { %v1954_v52 = vpop.f32.mrb[52].mxu1 }
 0x1da   : > { %v2046_v33 = vadd.f32 %v1954_v52, %v1723_v56  ;;  %v1956_v41 = vpop.f32.mrb[53].mxu1 }
 0x1db   : > { %v2047_v11 = vadd.f32 %v1956_v41, %v1724_v57  ;;  %v1958_v58 = vpop.f32.mrb[54].mxu1 }
 0x1dc   : > { %v1959_v34 = vpop.f32.mrb[55].mxu1 }
 0x1dd   : > { %v1995_v13 = vpop.f32.mrb[56].mxu0 }
 0x1de   : > { %v2048_v60 = vadd.f32 %v1995_v13, %v1725_v7  ;;  %v1997_v35 = vpop.f32.mrb[57].mxu0 }
 0x1df   : > { %v2049_v14 = vadd.f32 %v1997_v35, %v1726_v9  ;;  %v1999_v5 = vpop.f32.mrb[58].mxu0 }
 0x1e0   : > { %v2000_v36 = vpop.f32.mrb[59].mxu0 }
 0x1e1   : > { %v2036_v37 = vpop.f32.mrb[56].mxu1 }
 0x1e2   : > { %v2050_v10 = vadd.f32 %v2036_v37, %v1727_v24  ;;  %v5651_v4 = vpop.f32.mrb[57].mxu1 }
 0x1e3   : > { %v2039_v16 = vpop.f32.mrb[58].mxu1 }
 0x1e4   : > { %v5652_v38 = vpop.f32.mrb[59].mxu1 }
 0x1e5   : > { %v2195_v40 = vpop.f32.mrb[60].mxu0 }
 0x1e6   : > { %v2365_v17 = vadd.f32 %v2195_v40, %v2042_v29  ;;  %v2197_v42 = vpop.f32.mrb[61].mxu0 }
 0x1e7   : > { %v2366_v18 = vadd.f32 %v2197_v42, %v2043_v6  ;;  %v2199_v43 = vpop.f32.mrb[62].mxu0 }
 0x1e8   : > { %v2200_v45 = vpop.f32.mrb[63].mxu0 }
 0x1e9   : > { %v2236_v19 = vpop.f32.mrb[60].mxu1 }
 0x1ea   : > { %v2367_v20 = vadd.f32 %v2236_v19, %v2044_v31  ;;  %v2238_v47 = vpop.f32.mrb[61].mxu1 }
 0x1eb   : > { %v2368_v48 = vadd.f32 %v2238_v47, %v2045_v50  ;;  %v2240_v51 = vpop.f32.mrb[62].mxu1 }
 0x1ec   : > { %v2241_v49 = vpop.f32.mrb[63].mxu1 }
 0x1ed   : > { %v2277_v53 = vpop.f32.mrb[64].mxu0 }
 0x1ee   : > { %v2369_v55 = vadd.f32 %v2277_v53, %v2046_v33  ;;  %v2279_v54 = vpop.f32.mrb[65].mxu0 }
 0x1ef   : > { %v2370_v56 = vadd.f32 %v2279_v54, %v2047_v11  ;;  %v2281_v59 = vpop.f32.mrb[66].mxu0 }
 0x1f0   : > { %v2282_v61 = vpop.f32.mrb[67].mxu0 }
 0x1f1   : > { %v2318_v57 = vpop.f32.mrb[64].mxu1 }
 0x1f2   : > { %v2371_v62 = vadd.f32 %v2318_v57, %v2048_v60  ;;  %v2320_v63 = vpop.f32.mrb[65].mxu1 }
 0x1f3   : > { %v2372_v0 = vadd.f32 %v2320_v63, %v2049_v14  ;;  %v2322_v1 = vpop.f32.mrb[66].mxu1 }
 0x1f4   : > { %v2323_v2 = vpop.f32.mrb[67].mxu1 }
 0x1f5   : > { %v2359_v7 = vpop.f32.mrb[68].mxu0 }
 0x1f6   : > { %v2373_v3 = vadd.f32 %v2359_v7, %v2050_v10  ;;  %v5657_v9 = vpop.f32.mrb[69].mxu0 }
 0x1f7   : > { %v2362_v21 = vpop.f32.mrb[70].mxu0 }
 0x1f8   : > { %v5658_v15 = vpop.f32.mrb[71].mxu0 }
 0x1f9   : > { %v2518_v22 = vpop.f32.mrb[68].mxu1 }
 0x1fa   : > { %v2688_v23 = vadd.f32 %v2518_v22, %v2365_v17  ;;  %v2520_v24 = vpop.f32.mrb[69].mxu1 }
 0x1fb   : > { %v2689_v25 = vadd.f32 %v2520_v24, %v2366_v18  ;;  %v2522_v26 = vpop.f32.mrb[70].mxu1 }
 0x1fc   : > { %v2523_v27 = vpop.f32.mrb[71].mxu1 }
 0x1fd   : > { %v2559_v28 = vpop.f32.mrb[72].mxu0 }
 0x1fe   : > { %v2690_v29 = vadd.f32 %v2559_v28, %v2367_v20  ;;  %v2561_v39 = vpop.f32.mrb[73].mxu0 }
 0x1ff   : > { %v2691_v6 = vadd.f32 %v2561_v39, %v2368_v48  ;;  %v2563_v8 = vpop.f32.mrb[74].mxu0 }
 0x200   : > { %v2564_v30 = vpop.f32.mrb[75].mxu0 }
 0x201   : > { %v2600_v44 = vpop.f32.mrb[72].mxu1 }
 0x202   : > { %v2692_v31 = vadd.f32 %v2600_v44, %v2369_v55  ;;  %v2602_v46 = vpop.f32.mrb[73].mxu1 }
 0x203   : > { %v2693_v50 = vadd.f32 %v2602_v46, %v2370_v56  ;;  %v2604_v12 = vpop.f32.mrb[74].mxu1 }
 0x204   : > { %v2605_v32 = vpop.f32.mrb[75].mxu1 }
 0x205   : > { %v2641_v52 = vpop.f32.mrb[76].mxu0 }
 0x206   : > { %v2694_v33 = vadd.f32 %v2641_v52, %v2371_v62  ;;  %v2643_v41 = vpop.f32.mrb[77].mxu0 }
 0x207   : > { %v2695_v11 = vadd.f32 %v2643_v41, %v2372_v0  ;;  %v2645_v58 = vpop.f32.mrb[78].mxu0 }
 0x208   : > { %v2646_v34 = vpop.f32.mrb[79].mxu0 }
 0x209   : > { %v2682_v13 = vpop.f32.mrb[76].mxu1 }
 0x20a   : > { %v2696_v60 = vadd.f32 %v2682_v13, %v2373_v3  ;;  %v5663_v35 = vpop.f32.mrb[77].mxu1 }
 0x20b   : > { %v2685_v14 = vpop.f32.mrb[78].mxu1 }
 0x20c   : > { %v5664_v5 = vpop.f32.mrb[79].mxu1 }
 0x20d   : > { %v2841_v36 = vpop.f32.mrb[80].mxu0 }
 0x20e   : > { %v3011_v37 = vadd.f32 %v2841_v36, %v2688_v23  ;;  %v2843_v10 = vpop.f32.mrb[81].mxu0 }
 0x20f   : > { %v3012_v4 = vadd.f32 %v2843_v10, %v2689_v25  ;;  %v2845_v16 = vpop.f32.mrb[82].mxu0 }
 0x210   : > { %v2846_v38 = vpop.f32.mrb[83].mxu0 }
 0x211   : > { %v2882_v40 = vpop.f32.mrb[80].mxu1 }
 0x212   : > { %v3013_v17 = vadd.f32 %v2882_v40, %v2690_v29  ;;  %v2884_v42 = vpop.f32.mrb[81].mxu1 }
 0x213   : > { %v3014_v18 = vadd.f32 %v2884_v42, %v2691_v6  ;;  %v2886_v43 = vpop.f32.mrb[82].mxu1 }
 0x214   : > { %v2887_v45 = vpop.f32.mrb[83].mxu1 }
 0x215   : > { %v2923_v19 = vpop.f32.mrb[84].mxu0 }
 0x216   : > { %v3015_v20 = vadd.f32 %v2923_v19, %v2692_v31  ;;  %v2925_v47 = vpop.f32.mrb[85].mxu0 }
 0x217   : > { %v3016_v48 = vadd.f32 %v2925_v47, %v2693_v50  ;;  %v2927_v51 = vpop.f32.mrb[86].mxu0 }
 0x218   : > { %v2928_v49 = vpop.f32.mrb[87].mxu0 }
 0x219   : > { %v2964_v53 = vpop.f32.mrb[84].mxu1 }
 0x21a   : > { %v3017_v55 = vadd.f32 %v2964_v53, %v2694_v33  ;;  %v2966_v54 = vpop.f32.mrb[85].mxu1 }
 0x21b   : > { %v3018_v56 = vadd.f32 %v2966_v54, %v2695_v11  ;;  %v2968_v59 = vpop.f32.mrb[86].mxu1 }
 0x21c   : > { %v2969_v61 = vpop.f32.mrb[87].mxu1 }
 0x21d   : > { %v3005_v57 = vpop.f32.mrb[88].mxu0 }
 0x21e   : > { %v3019_v62 = vadd.f32 %v3005_v57, %v2696_v60  ;;  %v5669_v63 = vpop.f32.mrb[89].mxu0 }
 0x21f   : > { %v3008_v0 = vpop.f32.mrb[90].mxu0 }
 0x220   : > { %v5670_v1 = vpop.f32.mrb[91].mxu0 }
 0x221   : > { %v3164_v2 = vpop.f32.mrb[88].mxu1 }
 0x222   : > { %v3334_v7 = vadd.f32 %v3164_v2, %v3011_v37  ;;  %v3166_v3 = vpop.f32.mrb[89].mxu1 }
 0x223   : > { %v3335_v9 = vadd.f32 %v3166_v3, %v3012_v4  ;;  %v3168_v21 = vpop.f32.mrb[90].mxu1 }
 0x224   : > { %v3169_v15 = vpop.f32.mrb[91].mxu1 }
 0x225   : > { %v3205_v22 = vpop.f32.mrb[92].mxu0 }
 0x226   : > { %v3336_v23 = vadd.f32 %v3205_v22, %v3013_v17  ;;  %v3207_v24 = vpop.f32.mrb[93].mxu0 }
 0x227   : > { %v3337_v25 = vadd.f32 %v3207_v24, %v3014_v18  ;;  %v3209_v26 = vpop.f32.mrb[94].mxu0 }
 0x228   : > { %v3210_v27 = vpop.f32.mrb[95].mxu0 }
 0x229   : > { %v3246_v28 = vpop.f32.mrb[92].mxu1 }
 0x22a   : > { %v3338_v29 = vadd.f32 %v3246_v28, %v3015_v20  ;;  %v3248_v39 = vpop.f32.mrb[93].mxu1 }
 0x22b   : > { %v3339_v6 = vadd.f32 %v3248_v39, %v3016_v48  ;;  %v3250_v8 = vpop.f32.mrb[94].mxu1 }
 0x22c   : > { %v3251_v30 = vpop.f32.mrb[95].mxu1 }
 0x22d   : > { %v3287_v44 = vpop.f32.mrb[96].mxu0 }
 0x22e   : > { %v3340_v31 = vadd.f32 %v3287_v44, %v3017_v55  ;;  %v3289_v46 = vpop.f32.mrb[97].mxu0 }
 0x22f   : > { %v3341_v50 = vadd.f32 %v3289_v46, %v3018_v56  ;;  %v3291_v12 = vpop.f32.mrb[98].mxu0 }
 0x230   : > { %v3292_v32 = vpop.f32.mrb[99].mxu0 }
 0x231   : > { %v3328_v52 = vpop.f32.mrb[96].mxu1 }
 0x232   : > { %v3342_v33 = vadd.f32 %v3328_v52, %v3019_v62  ;;  %v5675_v41 = vpop.f32.mrb[97].mxu1 }
 0x233   : > { %v3331_v11 = vpop.f32.mrb[98].mxu1 }
 0x234   : > { %v5676_v58 = vpop.f32.mrb[99].mxu1 }
 0x235   : > { %v3487_v34 = vpop.f32.mrb[100].mxu0 }
 0x236   : > { %v3657_v13 = vadd.f32 %v3487_v34, %v3334_v7  ;;  %v3489_v60 = vpop.f32.mrb[101].mxu0 }
 0x237   : > { %v3658_v35 = vadd.f32 %v3489_v60, %v3335_v9  ;;  %v3491_v14 = vpop.f32.mrb[102].mxu0 }
 0x238   : > { %v3492_v5 = vpop.f32.mrb[103].mxu0 }
 0x239   : > { %v3528_v36 = vpop.f32.mrb[100].mxu1 }
 0x23a   : > { %v3659_v37 = vadd.f32 %v3528_v36, %v3336_v23  ;;  %v3530_v10 = vpop.f32.mrb[101].mxu1 }
 0x23b   : > { %v3660_v4 = vadd.f32 %v3530_v10, %v3337_v25  ;;  %v3532_v16 = vpop.f32.mrb[102].mxu1 }
 0x23c   : > { %v3533_v38 = vpop.f32.mrb[103].mxu1 }
 0x23d   : > { %v3569_v40 = vpop.f32.mrb[104].mxu0 }
 0x23e   : > { %v3661_v17 = vadd.f32 %v3569_v40, %v3338_v29  ;;  %v3571_v42 = vpop.f32.mrb[105].mxu0 }
 0x23f   : > { %v3662_v18 = vadd.f32 %v3571_v42, %v3339_v6  ;;  %v3573_v43 = vpop.f32.mrb[106].mxu0 }
 0x240   : > { %v3574_v45 = vpop.f32.mrb[107].mxu0 }
 0x241   : > { %v3610_v19 = vpop.f32.mrb[104].mxu1 }
 0x242   : > { %v3663_v20 = vadd.f32 %v3610_v19, %v3340_v31  ;;  %v3612_v47 = vpop.f32.mrb[105].mxu1 }
 0x243   : > { %v3664_v48 = vadd.f32 %v3612_v47, %v3341_v50  ;;  %v3614_v51 = vpop.f32.mrb[106].mxu1 }
 0x244   : > { %v3615_v49 = vpop.f32.mrb[107].mxu1 }
 0x245   : > { %v3651_v53 = vpop.f32.mrb[108].mxu0 }
 0x246   : > { %v3665_v55 = vadd.f32 %v3651_v53, %v3342_v33  ;;  %v5681_v54 = vpop.f32.mrb[109].mxu0 }
 0x247   : > { %v3654_v56 = vpop.f32.mrb[110].mxu0 }
 0x248   : > { %v5682_v59 = vpop.f32.mrb[111].mxu0 }
 0x249   : > { %v3810_v61 = vpop.f32.mrb[108].mxu1 }
 0x24a   : > { %v3980_v57 = vadd.f32 %v3810_v61, %v3657_v13  ;;  %v3812_v62 = vpop.f32.mrb[109].mxu1 }
 0x24b   : > { %v3981_v63 = vadd.f32 %v3812_v62, %v3658_v35  ;;  %v3814_v0 = vpop.f32.mrb[110].mxu1 }
 0x24c   : > { %v3815_v1 = vpop.f32.mrb[111].mxu1 }
 0x24d   : > { %v3851_v2 = vpop.f32.mrb[112].mxu0 }
 0x24e   : > { %v3982_v7 = vadd.f32 %v3851_v2, %v3659_v37  ;;  %v3853_v3 = vpop.f32.mrb[113].mxu0 }
 0x24f   : > { %v3983_v9 = vadd.f32 %v3853_v3, %v3660_v4  ;;  %v3855_v21 = vpop.f32.mrb[114].mxu0 }
 0x250   : > { %v3856_v15 = vpop.f32.mrb[115].mxu0 }
 0x251   : > { %v3892_v22 = vpop.f32.mrb[112].mxu1 }
 0x252   : > { %v3984_v23 = vadd.f32 %v3892_v22, %v3661_v17  ;;  %v3894_v24 = vpop.f32.mrb[113].mxu1 }
 0x253   : > { %v3985_v25 = vadd.f32 %v3894_v24, %v3662_v18  ;;  %v3896_v26 = vpop.f32.mrb[114].mxu1 }
 0x254   : > { %v3897_v27 = vpop.f32.mrb[115].mxu1 }
 0x255   : > { %v3933_v28 = vpop.f32.mrb[116].mxu0 }
 0x256   : > { %v3986_v29 = vadd.f32 %v3933_v28, %v3663_v20  ;;  %v3935_v39 = vpop.f32.mrb[117].mxu0 }
 0x257   : > { %v3987_v6 = vadd.f32 %v3935_v39, %v3664_v48  ;;  %v3937_v8 = vpop.f32.mrb[118].mxu0 }
 0x258   : > { %v3938_v30 = vpop.f32.mrb[119].mxu0 }
 0x259   : > { %v3974_v44 = vpop.f32.mrb[116].mxu1 }
 0x25a   : > { %v3988_v31 = vadd.f32 %v3974_v44, %v3665_v55  ;;  %v5687_v46 = vpop.f32.mrb[117].mxu1 }
 0x25b   : > { %v3977_v50 = vpop.f32.mrb[118].mxu1 }
 0x25c   : > { %v5688_v12 = vpop.f32.mrb[119].mxu1 }
 0x25d   : > { %v4133_v32 = vpop.f32.mrb[120].mxu0 }
 0x25e   : > { %v4303_v52 = vadd.f32 %v4133_v32, %v3980_v57  ;;  %v4135_v33 = vpop.f32.mrb[121].mxu0 }
 0x25f   : > { %v4304_v41 = vadd.f32 %v4135_v33, %v3981_v63  ;;  %v4137_v11 = vpop.f32.mrb[122].mxu0 }
 0x260   : > { %v4138_v58 = vpop.f32.mrb[123].mxu0 }
 0x261   : > { %v4174_v34 = vpop.f32.mrb[120].mxu1 }
 0x262   : > { %v4305_v13 = vadd.f32 %v4174_v34, %v3982_v7  ;;  %v4176_v60 = vpop.f32.mrb[121].mxu1 }
 0x263   : > { %v4306_v35 = vadd.f32 %v4176_v60, %v3983_v9  ;;  %v4178_v14 = vpop.f32.mrb[122].mxu1 }
 0x264   : > { %v4179_v5 = vpop.f32.mrb[123].mxu1 }
 0x265   : > { %v4215_v36 = vpop.f32.mrb[124].mxu0 }
 0x266   : > { %v4307_v37 = vadd.f32 %v4215_v36, %v3984_v23  ;;  %v4217_v10 = vpop.f32.mrb[125].mxu0 }
 0x267   : > { %v4308_v4 = vadd.f32 %v4217_v10, %v3985_v25  ;;  %v4219_v16 = vpop.f32.mrb[126].mxu0 }
 0x268   : > { %v4220_v38 = vpop.f32.mrb[127].mxu0 }
 0x269   : > { %v4256_v40 = vpop.f32.mrb[124].mxu1 }
 0x26a   : > { %v4309_v17 = vadd.f32 %v4256_v40, %v3986_v29  ;;  %v4258_v42 = vpop.f32.mrb[125].mxu1 }
 0x26b   : > { %v4310_v18 = vadd.f32 %v4258_v42, %v3987_v6  ;;  %v4260_v43 = vpop.f32.mrb[126].mxu1 }
 0x26c   : > { %v4261_v45 = vpop.f32.mrb[127].mxu1 }
 0x26d   : > { %v4297_v19 = vpop.f32.mrb[128].mxu0 }
 0x26e   : > { %v4311_v20 = vadd.f32 %v4297_v19, %v3988_v31  ;;  %v5693_v47 = vpop.f32.mrb[129].mxu0  ;;  %v5285_v19 = vpop.permute.xlu0 %5284 }
 0x26f   : > { %v4300_v48 = vpop.f32.mrb[130].mxu0 }
 0x270   : > { %v5694_v51 = vpop.f32.mrb[131].mxu0 }
 0x271   : > { %v4456_v49 = vpop.f32.mrb[128].mxu1 }
 0x272   : > { %v4626_v53 = vadd.f32 %v4456_v49, %v4303_v52  ;;  %v4458_v55 = vpop.f32.mrb[129].mxu1 }
 0x273   : > { %v4627_v54 = vadd.f32 %v4458_v55, %v4304_v41  ;;  %v4460_v56 = vpop.f32.mrb[130].mxu1 }
 0x274   : > { %v4461_v59 = vpop.f32.mrb[131].mxu1 }
 0x275   : > { %v4497_v61 = vpop.f32.mrb[132].mxu0 }
 0x276   : > { %v4628_v57 = vadd.f32 %v4497_v61, %v4305_v13  ;;  %v4499_v62 = vpop.f32.mrb[133].mxu0 }
 0x277   : > { %v4629_v63 = vadd.f32 %v4499_v62, %v4306_v35  ;;  %v4501_v0 = vpop.f32.mrb[134].mxu0 }
 0x278   : > { %v4502_v1 = vpop.f32.mrb[135].mxu0 }
 0x279   : > { %v4538_v2 = vpop.f32.mrb[132].mxu1 }
 0x27a   : > { %v4630_v7 = vadd.f32 %v4538_v2, %v4307_v37  ;;  %v4540_v3 = vpop.f32.mrb[133].mxu1 }
 0x27b   : > { %v4631_v9 = vadd.f32 %v4540_v3, %v4308_v4  ;;  %v4542_v21 = vpop.f32.mrb[134].mxu1 }
 0x27c   : > { %v4543_v15 = vpop.f32.mrb[135].mxu1 }
 0x27d   : > { %v4579_v22 = vpop.f32.mrb[136].mxu0 }
 0x27e   : > { %v4632_v23 = vadd.f32 %v4579_v22, %v4309_v17  ;;  %v4581_v24 = vpop.f32.mrb[137].mxu0 }
 0x27f   : > { %v4633_v25 = vadd.f32 %v4581_v24, %v4310_v18  ;;  %v4583_v26 = vpop.f32.mrb[138].mxu0 }
 0x280   : > { %v4584_v27 = vpop.f32.mrb[139].mxu0 }
 0x281   : > { %v4620_v28 = vpop.f32.mrb[136].mxu1 }
 0x282   : > { %v4634_v29 = vadd.f32 %v4620_v28, %v4311_v20  ;;  %v5699_v39 = vpop.f32.mrb[137].mxu1 }
 0x283   : > { %v4623_v6 = vpop.f32.mrb[138].mxu1 }
 0x284   : > { %v5700_v8 = vpop.f32.mrb[139].mxu1 }
 0x285   : > { %v4779_v30 = vpop.f32.mrb[140].mxu0 }
 0x286   : > { %v4949_v44 = vadd.f32 %v4779_v30, %v4626_v53  ;;  %v4781_v31 = vpop.f32.mrb[141].mxu0 }
 0x287   : > { %v4950_v46 = vadd.f32 %v4781_v31, %v4627_v54  ;;  %v4783_v50 = vpop.f32.mrb[142].mxu0 }
 0x288   : > { %v4784_v12 = vpop.f32.mrb[143].mxu0 }
 0x289   : > { %v4820_v32 = vpop.f32.mrb[140].mxu1 }
 0x28a   : > { %v4951_v52 = vadd.f32 %v4820_v32, %v4628_v57  ;;  %v4822_v33 = vpop.f32.mrb[141].mxu1 }
 0x28b   : > { %v4952_v41 = vadd.f32 %v4822_v33, %v4629_v63  ;;  %v4824_v11 = vpop.f32.mrb[142].mxu1 }
 0x28c   : > { %v4825_v58 = vpop.f32.mrb[143].mxu1 }
 0x28d   : > { %v4861_v34 = vpop.f32.mrb[144].mxu0 }
 0x28e   : > { %v4953_v13 = vadd.f32 %v4861_v34, %v4630_v7  ;;  %v4863_v60 = vpop.f32.mrb[145].mxu0 }
 0x28f   : > { %v4954_v35 = vadd.f32 %v4863_v60, %v4631_v9  ;;  %v4865_v14 = vpop.f32.mrb[146].mxu0 }
 0x290   : > { %v4866_v5 = vpop.f32.mrb[147].mxu0 }
 0x291   : > { %v4902_v36 = vpop.f32.mrb[144].mxu1 }
 0x292   : > { %v4955_v37 = vadd.f32 %v4902_v36, %v4632_v23  ;;  %v4904_v10 = vpop.f32.mrb[145].mxu1 }
 0x293   : > { %v4956_v4 = vadd.f32 %v4904_v10, %v4633_v25  ;;  %v4906_v16 = vpop.f32.mrb[146].mxu1 }
 0x294   : > { %v4907_v38 = vpop.f32.mrb[147].mxu1 }
 0x295   : > { %v4943_v40 = vpop.f32.mrb[148].mxu0 }
 0x296   : > { %v4957_v17 = vadd.f32 %v4943_v40, %v4634_v29  ;;  %v5705_v42 = vpop.f32.mrb[149].mxu0 }
 0x297   : > { %v4946_v18 = vpop.f32.mrb[150].mxu0 }
 0x298   : > { %v5706_v43 = vpop.f32.mrb[151].mxu0 }
 0x299   : > { %v5102_v45 = vpop.f32.mrb[148].mxu1 }
 0x29a   : > { %v5272_v20 = vadd.f32 %v5102_v45, %v4949_v44  ;;  %v5104_v47 = vpop.f32.mrb[149].mxu1 }
 0x29b   : > { %v5273_v48 = vadd.f32 %v5104_v47, %v4950_v46  ;;  %v5106_v51 = vpop.f32.mrb[150].mxu1 }
 0x29c   : > { %v5287_v49 = vadd.f32 %v5285_v19, %v5272_v20  ;;  %v5107_v53 = vpop.f32.mrb[151].mxu1 }
 0x29d   : > { %v5288_v55 = vadd.f32 %v5285_v19, %v5273_v48  ;;  %v5143_v54 = vpop.f32.mrb[152].mxu0 }
 0x29e   : > { %5296 = vst [vmem:[%s6971_s5] sm:$0xff] %v5287_v49  ;;  %v5274_v56 = vadd.f32 %v5143_v54, %v4951_v52  ;;  %v5145_v59 = vpop.f32.mrb[153].mxu0 }
 0x29f   : > { %5297 = vst [vmem:[%s6971_s5 + $0x8] sm:$0xff] %v5288_v55  ;;  %v5275_v61 = vadd.f32 %v5145_v59, %v4952_v41  ;;  %v5147_v57 = vpop.f32.mrb[154].mxu0 }
 0x2a0   : > { %v5289_v62 = vadd.f32 %v5285_v19, %v5274_v56  ;;  %v5148_v63 = vpop.f32.mrb[155].mxu0 }
 0x2a1   : > { %v5290_v0 = vadd.f32 %v5285_v19, %v5275_v61  ;;  %v5184_v1 = vpop.f32.mrb[152].mxu1 }
 0x2a2   : > { %5298 = vst [vmem:[%s6971_s5 + $0x10] sm:$0xff] %v5289_v62  ;;  %v5276_v2 = vadd.f32 %v5184_v1, %v4953_v13  ;;  %v5186_v7 = vpop.f32.mrb[153].mxu1 }
 0x2a3   : > { %5299 = vst [vmem:[%s6971_s5 + $0x18] sm:$0xff] %v5290_v0  ;;  %v5277_v3 = vadd.f32 %v5186_v7, %v4954_v35  ;;  %v5188_v9 = vpop.f32.mrb[154].mxu1 }
 0x2a4   : > { %v5291_v21 = vadd.f32 %v5285_v19, %v5276_v2  ;;  %v5189_v15 = vpop.f32.mrb[155].mxu1 }
 0x2a5   : > { %v5292_v22 = vadd.f32 %v5285_v19, %v5277_v3  ;;  %v5225_v23 = vpop.f32.mrb[156].mxu0 }
 0x2a6   : > { %5300 = vst [vmem:[%s6971_s5 + $0x20] sm:$0xff] %v5291_v21  ;;  %v5278_v24 = vadd.f32 %v5225_v23, %v4955_v37  ;;  %v5227_v25 = vpop.f32.mrb[157].mxu0 }
 0x2a7   : > { %5301 = vst [vmem:[%s6971_s5 + $0x28] sm:$0xff] %v5292_v22  ;;  %v5279_v26 = vadd.f32 %v5227_v25, %v4956_v4  ;;  %v5229_v27 = vpop.f32.mrb[158].mxu0 }
 0x2a8   : > { %v5293_v28 = vadd.f32 %v5285_v19, %v5278_v24  ;;  %v5230_v29 = vpop.f32.mrb[159].mxu0 }
 0x2a9   : > { %v5294_v39 = vadd.f32 %v5285_v19, %v5279_v26  ;;  %v5266_v6 = vpop.f32.mrb[156].mxu1 }
 0x2aa   : > { %5302 = vst [vmem:[%s6971_s5 + $0x30] sm:$0xff] %v5293_v28  ;;  %v5280_v8 = vadd.f32 %v5266_v6, %v4957_v17  ;;  %v5711_v30 = vpop.f32.mrb[157].mxu1 }
 0x2ab   : > { %5303 = vst [vmem:[%s6971_s5 + $0x38] sm:$0xff] %v5294_v39  ;;  %v5269_v44 = vpop.f32.mrb[158].mxu1 }
 0x2ac   : > { %v5295_v31 = vadd.f32 %v5285_v19, %v5280_v8  ;;  %v5712_v46 = vpop.f32.mrb[159].mxu1 }
 0x2ae   : > { %5304 = vst [vmem:[%s6971_s5 + $0x40] sm:$0xff] %v5295_v31 }
 0x2af   : > { %5808 = shalt.err (!%p5805_p5)
}
 0x2b0   : > { %s5809_s21 = scalar_lea.hbm %s6986_s10, 1152  ;;  %s5813_s27 = scalar_lea.hbm %s7039_s3, 2304 }
 0x2b1   : > { %p5810_p6 = scmp.ne.s32.totalorder %s6986_s10, %s5809_s21  ;;  %p5814_p10 = scmp.lt.u32.totalorder %s6986_s10, %s7039_s3 }
 0x2b2   : > { %p5815_p11 = scmp.lt.u32.totalorder %s5813_s27, %s5809_s21  ;;  %p5817_p13 = scmp.lt.u32.totalorder %s5809_s21, %s6986_s10 }
 0x2b3   : > { %p5811_p7 = pnand %p5810_p6, %p5955_p4 }
 0x2b4   : > { %p5816_p12 = por %p5815_p11, %p5814_p10 }
 0x2b5   : > { %p5812_p9 = pneg %p5811_p7 }
 0x2b6   : > { %p5818_p0 = por %p5817_p13, %p5816_p12 }
 0x2b8   : > { %p5819_p1 = pnand %p5818_p0, %p5812_p9 }
 0x2ba   : > { %5822 = shalt.err (!%p5819_p1)
}
 0x2bb   : > { %5716 = dma.vmem_to_hbm [thread:$0]  (%p5955_p4), %s6988_s7, 1152, %s6986_s10, %s5306_s15  }
 0x2bc PF: > { %p5722_p2 = scmp.ge.s32.totalorder %s5873_s17, 2  ;;  %s5334_s4 = sand.u32 1, %s5853_s12  }
 0x2bd   : > { %s5335_s5 = scalar_lea.sflag [#allocation3], %s5334_s4 }
 0x2be   : > { %p5719_p3 = pnand %p5722_p2, %p5962_p8 }
 0x2c0   : > { %5848 = dma.done.wait (!%p5719_p3), %s5335_s5, 1152  }
 0x2c1   : > { %5850 = vsyncadd (!%p5719_p3), %s5335_s5, 4294966144  ;;  %s16_s17 = sadd.s32 1, %s5873_s17   ;;  %s7042_s12 = smov %s5857_s13 }
 0x2c2   : > { %p13_p5 = scmp.ge.s32.totalorder %s16_s17, 4   ;;  %s7043_s13 = smov %s5861_s14 }
 0x2c3   : > { %s7044_s14 = smov %s5968_s25  ;;  %s7045_s15 = smov %s5869_s16 }
 0x2c4   : > { %s7046_s16 = smov %s7048_s20  ;;  %15 = sbr.rel (!%p13_p5) target bundleno = 4 (0x4), region = 82 }
 0x2cb   :  { %5340 = vsyncpa [#allocation3], 1 }
 0x2cc   :  { %5342 = vsyncpa [#allocation3 + $0x1], 1 }

</bundles_post_ra>
